<compile_context>
chip_gen: v7x
topology: tpu7x:2x2x1
jax: 0.10.0
libtpu: 0.0.40
codegen_flags: <defaults>
</compile_context>

<pallas_src>
import jax
import jax.numpy as jnp
from jax.experimental import pallas as pl
from jax.experimental.pallas import tpu as pltpu


# ---------------------------------------------------------------------------
# Fused kernel: stacked bidirectional LSTM over the whole sequence.
# ---------------------------------------------------------------------------
def _make_encoder_kernel(num_layers, seq_len, batch):
    """Build the fused stacked-bidirectional-LSTM kernel.

    Ref layout (all 2D, rows = T*B in time-major order, row = t*B + b):
      x_ref              : (T*B, D)        embedded input
      per layer (3 refs) : wih (D_in, 8H), whh (2H, 8H) block-diag, b (1, 8H)
      out_ref            : (T*B, 2H)       last-layer [fwd | bwd] outputs
      mid_sc  (scratch)  : (T*B, 2H)       inter-layer activations
      gx_sc   (scratch)  : (T*B, 8H)       hoisted input projections
    """

    def kernel(*refs):
        x_ref = refs[0]
        w_refs = refs[1:1 + 3 * num_layers]
        out_ref = refs[1 + 3 * num_layers]
        mid_sc = refs[2 + 3 * num_layers]
        gx_sc = refs[3 + 3 * num_layers]

        T, B = seq_len, batch
        H2 = out_ref.shape[-1]          # 2H (fwd/bwd concat width)
        H = H2 // 2
        G = gx_sc.shape[-1]             # 8H (4 gates x 2 directions)

        # Forward-direction column mask for the gate-grouped, direction-
        # interleaved layout [i_f i_b | f_f f_b | g_f g_b | o_f o_b].
        # H is a power of two, so `& (2H-1)` == `% 2H`.
        lane = jax.lax.broadcasted_iota(jnp.int32, (B, G), 1)
        fwd_mask = jnp.bitwise_and(lane, 2 * H - 1) < H

        def run_layer(in_ref, wih_ref, whh_ref, b_ref, out_dst):
            # Input projection for every timestep and both directions in ONE
            # MXU matmul, hoisted off the serial recurrence.
            gx_sc[...] = (
                jnp.dot(in_ref[...], wih_ref[...],
                        preferred_element_type=jnp.float32)
                + b_ref[...])

            whh = whh_ref[...]                        # (2H, 8H), loaded once
            h_cat = jnp.zeros((B, H2), jnp.float32)   # [h_fwd | h_bwd]
            c_cat = jnp.zeros((B, H2), jnp.float32)   # [c_fwd | c_bwd]

            # Fully unrolled recurrence (T small & static) -> static slices.
            for t in range(T):
                tb = T - 1 - t
                # fwd columns use x[t]; bwd columns use x[T-1-t].
                gates_x = jnp.where(fwd_mask,
                                    gx_sc[t * B:(t + 1) * B, :],
                                    gx_sc[tb * B:(tb + 1) * B, :])
                gates = gates_x + jnp.dot(
                    h_cat, whh, preferred_element_type=jnp.float32)

                sig = jax.nn.sigmoid(gates)   # one full-width EUP pass
                tah = jnp.tanh(gates)         # one full-width EUP pass
                i_g = sig[:, 0 * H2:1 * H2]   # PyTorch gate order [i, f, g, o]
                f_g = sig[:, 1 * H2:2 * H2]
                g_g = tah[:, 2 * H2:3 * H2]
                o_g = sig[:, 3 * H2:4 * H2]

                c_cat = f_g * c_cat + i_g * g_g
                h_cat = o_g * jnp.tanh(c_cat)

                out_dst[t * B:(t + 1) * B, 0:H] = h_cat[:, 0:H]      # fwd @ t
                out_dst[tb * B:(tb + 1) * B, H:H2] = h_cat[:, H:H2]  # bwd @ tb

        cur_ref = x_ref
        for layer in range(num_layers):
            wih_ref, whh_ref, b_ref = w_refs[3 * layer:3 * (layer + 1)]
            dst = out_ref if layer == num_layers - 1 else mid_sc
            # inter-layer dropout (p=0.5) -> identity in eval semantics
            run_layer(cur_ref, wih_ref, whh_ref, b_ref, dst)
            cur_ref = mid_sc

    return kernel


def encoder_lstm(x_flat, layer_params, seq_len, batch):
    """Run the fused stacked bidirectional LSTM.

    x_flat:       (T*B, D) float32, time-major rows (row = t*B + b)
    layer_params: tuple of (wih, whh, b) packed per layer (_pack_bidir_layer)
    returns:      (T*B, 2H) float32, same row order, columns = [fwd_H | bwd_H]
    """
    num_layers = len(layer_params)
    tb_rows = x_flat.shape[0]
    h2 = layer_params[0][1].shape[0]          # whh rows = 2H
    g = layer_params[0][0].shape[1]           # 8H
    assert h2 & (h2 - 1) == 0, "hidden_size must be a power of two (lane mask)"

    def full_spec(shape):
        return pl.BlockSpec(shape, lambda *_: (0,) * len(shape))

    in_specs = [full_spec(x_flat.shape)]
    flat_args = [x_flat]
    for wih, whh, b in layer_params:
        in_specs += [full_spec(wih.shape), full_spec(whh.shape),
                     full_spec(b.shape)]
        flat_args += [wih, whh, b]

    return pl.pallas_call(
        _make_encoder_kernel(num_layers, seq_len, batch),
        out_shape=jax.ShapeDtypeStruct((tb_rows, h2), jnp.float32),
        grid=(1,),                       # whole problem fits VMEM trivially
        in_specs=in_specs,
        out_specs=full_spec((tb_rows, h2)),
        scratch_shapes=[
            pltpu.VMEM((tb_rows, h2), jnp.float32),   # inter-layer activations
            pltpu.VMEM((tb_rows, g), jnp.float32),    # hoisted input projections
        ],
        compiler_params=pltpu.CompilerParams(
            dimension_semantics=("arbitrary",)),
    )(*flat_args)


# ---------------------------------------------------------------------------
# Weight packing: PyTorch nn.LSTM layout -> fused kernel layout
# ---------------------------------------------------------------------------
def _pack_bidir_layer(w_ih_f, w_hh_f, b_f, w_ih_b, w_hh_b, b_b):
    """Pack one bidirectional LSTM layer into the fused layout.

    PyTorch per direction: w_ih (4H, D_in), w_hh (4H, H), b = b_ih + b_hh (4H,),
    gate order [i, f, g, o].

    Fused layout (columns gate-grouped & direction-interleaved, blocks H wide:
    [i_f i_b | f_f f_b | g_f g_b | o_f o_b]):
      wih : (D_in, 8H)  input projection for both directions
      whh : (2H,  8H)   block-diagonal recurrent weights for h_cat=[h_f | h_b]
      b   : (1,   8H)
    """
    H = w_hh_f.shape[1]

    def interleave(a_f, a_b):                 # (rows, 4H) x2 -> (rows, 8H)
        rows = a_f.shape[0]
        return jnp.stack(
            [a_f.reshape(rows, 4, H), a_b.reshape(rows, 4, H)],
            axis=2).reshape(rows, 8 * H)

    wih = interleave(w_ih_f.T, w_ih_b.T)                     # (D_in, 8H)
    zero = jnp.zeros((H, 4 * H), jnp.float32)
    whh = jnp.concatenate(
        [interleave(w_hh_f.T, zero),                         # rows 0:H  -> h_f
         interleave(zero, w_hh_b.T)],                        # rows H:2H -> h_b
        axis=0)                                              # (2H, 8H)
    b = interleave(b_f[None, :], b_b[None, :])               # (1, 8H)
    return wih, whh, b


def init_params(key, vocab_size, dims, hidden_size, num_layers):
    params = {}
    key, k_emb = jax.random.split(key)
    params["embedding"] = jax.random.normal(
        k_emb, (vocab_size, dims), jnp.float32)

    bound = 1.0 / (hidden_size ** 0.5)
    layers = []
    for layer in range(num_layers):
        in_dim = dims if layer == 0 else 2 * hidden_size
        dirs = []
        for _ in range(2):                                   # fwd, bwd
            key, k1, k2, k3, k4 = jax.random.split(key, 5)
            w_ih = jax.random.uniform(k1, (4 * hidden_size, in_dim),
                                      jnp.float32, -bound, bound)
            w_hh = jax.random.uniform(k2, (4 * hidden_size, hidden_size),
                                      jnp.float32, -bound, bound)
            b_ih = jax.random.uniform(k3, (4 * hidden_size,),
                                      jnp.float32, -bound, bound)
            b_hh = jax.random.uniform(k4, (4 * hidden_size,),
                                      jnp.float32, -bound, bound)
            dirs.append((w_ih, w_hh, b_ih + b_hh))
        (wf_ih, wf_hh, bf), (wb_ih, wb_hh, bb) = dirs
        layers.append(_pack_bidir_layer(wf_ih, wf_hh, bf, wb_ih, wb_hh, bb))
    params["layers"] = tuple(layers)
    return params


# ---------------------------------------------------------------------------
# Encoder forward: embedding -> (dropout=id) -> fused bidirectional LSTM stack
# ---------------------------------------------------------------------------
@jax.jit
def encoder_forward(x_bt, params):
    """x_bt: (B, T) int32 token ids -> (B, T, 2H) float32 (batch_first)."""
    B, T = x_bt.shape
    # Embedding lookup emitted directly in time-major order (gather output is
    # (T, B, D)), so no HBM transpose of float activations is needed.
    emb = params["embedding"][x_bt.T]                 # (T, B, D)
    # embedding dropout (p=0.5) -> identity in eval semantics
    D = emb.shape[-1]
    out_flat = encoder_lstm(emb.reshape(T * B, D), params["layers"], T, B)
    h2 = out_flat.shape[-1]
    return jnp.transpose(out_flat.reshape(T, B, h2), (1, 0, 2))  # (B, T, 2H)


if __name__ == "__main__":
    # Small shapes consistent with the module: batch=2, seq=8,
    # dims=hidden_size=32, num_layers=2, vocab=3 (source_vocab).
    VOCAB, DIMS, HIDDEN, NUM_LAYERS = 3, 32, 32, 2
    B, T = 2, 8

    key = jax.random.PRNGKey(0)
    key, k_x, k_p = jax.random.split(key, 3)
    x = jax.random.randint(k_x, (B, T), 0, VOCAB, dtype=jnp.int32)
    params = init_params(k_p, VOCAB, DIMS, HIDDEN, NUM_LAYERS)

    out = encoder_forward(x, params)
    out = jax.block_until_ready(out)

    assert out.shape == (B, T, 2 * HIDDEN), out.shape
    assert out.dtype == jnp.float32
    assert bool(jnp.all(jnp.isfinite(out)))
    print("KERNEL_OK")
</pallas_src>

<mosaic_0001>
module attributes {stable_mosaic.version = 11 : i64} {
  func.func @kernel(%arg0: i32, %arg1: memref<16x32xf32, #tpu.memory_space<vmem>>, %arg2: memref<32x256xf32, #tpu.memory_space<vmem>>, %arg3: memref<64x256xf32, #tpu.memory_space<vmem>>, %arg4: memref<1x256xf32, #tpu.memory_space<vmem>>, %arg5: memref<64x256xf32, #tpu.memory_space<vmem>>, %arg6: memref<64x256xf32, #tpu.memory_space<vmem>>, %arg7: memref<1x256xf32, #tpu.memory_space<vmem>>, %arg8: memref<16x64xf32, #tpu.memory_space<vmem>>, %arg9: memref<16x64xf32, #tpu.memory_space<vmem>>, %arg10: memref<16x256xf32, #tpu.memory_space<vmem>>) attributes {dimension_semantics = [#tpu.dimension_semantics<arbitrary>], iteration_bounds = array<i64: 1>, scalar_prefetch = 0 : i64, scratch_operands = 2 : i64, tpu.core_type = #tpu.core_type<tc>, window_params = [{pipeline_mode = #tpu.pipeline_mode<synchronous>, transform_indices = @transform_0, window_bounds = array<i64: 16, 32>}, {pipeline_mode = #tpu.pipeline_mode<synchronous>, transform_indices = @transform_1, window_bounds = array<i64: 32, 256>}, {pipeline_mode = #tpu.pipeline_mode<synchronous>, transform_indices = @transform_2, window_bounds = array<i64: 64, 256>}, {pipeline_mode = #tpu.pipeline_mode<synchronous>, transform_indices = @transform_3, window_bounds = array<i64: 1, 256>}, {pipeline_mode = #tpu.pipeline_mode<synchronous>, transform_indices = @transform_4, window_bounds = array<i64: 64, 256>}, {pipeline_mode = #tpu.pipeline_mode<synchronous>, transform_indices = @transform_5, window_bounds = array<i64: 64, 256>}, {pipeline_mode = #tpu.pipeline_mode<synchronous>, transform_indices = @transform_6, window_bounds = array<i64: 1, 256>}, {pipeline_mode = #tpu.pipeline_mode<synchronous>, transform_indices = @transform_7, window_bounds = array<i64: 16, 64>}]} {
    %0 = tpu.iota {dimensions = array<i32: 1>} : vector<2x256xi32>
    %c63_i32 = arith.constant 63 : i32
    %1 = vector.broadcast %c63_i32 : i32 to vector<2x256xi32>
    %2 = arith.andi %0, %1 : vector<2x256xi32>
    %c32_i32 = arith.constant 32 : i32
    %3 = vector.broadcast %c32_i32 : i32 to vector<2x256xi32>
    %4 = arith.cmpi slt, %2, %3 : vector<2x256xi32>
    %c0 = arith.constant 0 : index
    %c0_0 = arith.constant 0 : index
    %5 = vector.load %arg1[%c0, %c0_0] : memref<16x32xf32, #tpu.memory_space<vmem>>, vector<16x32xf32>
    %c0_1 = arith.constant 0 : index
    %c0_2 = arith.constant 0 : index
    %6 = vector.load %arg2[%c0_1, %c0_2] : memref<32x256xf32, #tpu.memory_space<vmem>>, vector<32x256xf32>
    %cst = arith.constant dense<0.000000e+00> : vector<16x256xf32>
    %7 = tpu.matmul %5, %6, %cst {dimension_numbers = #tpu.dot_dimension_numbers<[1], [0], [0], [1], [0, 0, 1, 1], [], []>} : vector<16x32xf32>, vector<32x256xf32>, vector<16x256xf32> -> vector<16x256xf32>
    %c0_3 = arith.constant 0 : index
    %c0_4 = arith.constant 0 : index
    %8 = vector.load %arg4[%c0_3, %c0_4] : memref<1x256xf32, #tpu.memory_space<vmem>>, vector<1x256xf32>
    %9 = vector.broadcast %8 : vector<1x256xf32> to vector<16x256xf32>
    %10 = arith.addf %7, %9 : vector<16x256xf32>
    %c0_5 = arith.constant 0 : index
    %c0_6 = arith.constant 0 : index
    %11 = vector.load %arg10[%c0_5, %c0_6] : memref<16x256xf32, #tpu.memory_space<vmem>>, vector<16x256xf32>
    tpu.vector_store %arg10[%c0_5, %c0_6], %10 {strides = array<i32>} : memref<16x256xf32, #tpu.memory_space<vmem>>, vector<16x256xf32>,
    %c0_7 = arith.constant 0 : index
    %c0_8 = arith.constant 0 : index
    %12 = vector.load %arg3[%c0_7, %c0_8] : memref<64x256xf32, #tpu.memory_space<vmem>>, vector<64x256xf32>
    %cst_9 = arith.constant 0.000000e+00 : f32
    %13 = vector.broadcast %cst_9 : f32 to vector<2x64xf32>
    %cst_10 = arith.constant 0.000000e+00 : f32
    %14 = vector.broadcast %cst_10 : f32 to vector<2x64xf32>
    %c0_11 = arith.constant 0 : index
    %c0_12 = arith.constant 0 : index
    %15 = vector.load %arg10[%c0_11, %c0_12] : memref<16x256xf32, #tpu.memory_space<vmem>>, vector<2x256xf32>
    %c14 = arith.constant 14 : index
    %c0_13 = arith.constant 0 : index
    %16 = vector.load %arg10[%c14, %c0_13] : memref<16x256xf32, #tpu.memory_space<vmem>>, vector<2x256xf32>
    %17 = arith.select %4, %15, %16 : vector<2x256xi1>, vector<2x256xf32>
    %cst_14 = arith.constant dense<0.000000e+00> : vector<2x256xf32>
    %18 = tpu.matmul %13, %12, %cst_14 {dimension_numbers = #tpu.dot_dimension_numbers<[1], [0], [0], [1], [0, 0, 1, 1], [], []>} : vector<2x64xf32>, vector<64x256xf32>, vector<2x256xf32> -> vector<2x256xf32>
    %19 = arith.addf %17, %18 : vector<2x256xf32>
    %20 = arith.negf %19 : vector<2x256xf32>
    %21 = math.exp %20 : vector<2x256xf32>
    %cst_15 = arith.constant 1.000000e+00 : f32
    %22 = vector.broadcast %cst_15 : f32 to vector<2x256xf32>
    %23 = arith.addf %22, %21 : vector<2x256xf32>
    %24 = arith.divf %22, %23 : vector<2x256xf32>
    %25 = math.tanh %19 : vector<2x256xf32>
    %26 = vector.extract_strided_slice %24 {offsets = [0, 0], sizes = [2, 64], strides = [1, 1]} : vector<2x256xf32> to vector<2x64xf32>
    %27 = vector.extract_strided_slice %24 {offsets = [0, 64], sizes = [2, 64], strides = [1, 1]} : vector<2x256xf32> to vector<2x64xf32>
    %28 = vector.extract_strided_slice %25 {offsets = [0, 128], sizes = [2, 64], strides = [1, 1]} : vector<2x256xf32> to vector<2x64xf32>
    %29 = vector.extract_strided_slice %24 {offsets = [0, 192], sizes = [2, 64], strides = [1, 1]} : vector<2x256xf32> to vector<2x64xf32>
    %30 = arith.mulf %27, %14 : vector<2x64xf32>
    %31 = arith.mulf %26, %28 : vector<2x64xf32>
    %32 = arith.addf %30, %31 : vector<2x64xf32>
    %33 = math.tanh %32 : vector<2x64xf32>
    %34 = arith.mulf %29, %33 : vector<2x64xf32>
    %35 = vector.extract_strided_slice %34 {offsets = [0, 0], sizes = [2, 32], strides = [1, 1]} : vector<2x64xf32> to vector<2x32xf32>
    %c0_16 = arith.constant 0 : index
    %c0_17 = arith.constant 0 : index
    %36 = vector.load %arg9[%c0_16, %c0_17] : memref<16x64xf32, #tpu.memory_space<vmem>>, vector<2x32xf32>
    tpu.vector_store %arg9[%c0_16, %c0_17], %35 {strides = array<i32>} : memref<16x64xf32, #tpu.memory_space<vmem>>, vector<2x32xf32>,
    %37 = vector.extract_strided_slice %34 {offsets = [0, 32], sizes = [2, 32], strides = [1, 1]} : vector<2x64xf32> to vector<2x32xf32>
    %c14_18 = arith.constant 14 : index
    %c32 = arith.constant 32 : index
    %38 = vector.load %arg9[%c14_18, %c32] : memref<16x64xf32, #tpu.memory_space<vmem>>, vector<2x32xf32>
    tpu.vector_store %arg9[%c14_18, %c32], %37 {strides = array<i32>} : memref<16x64xf32, #tpu.memory_space<vmem>>, vector<2x32xf32>,
    %c2 = arith.constant 2 : index
    %c0_19 = arith.constant 0 : index
    %39 = vector.load %arg10[%c2, %c0_19] : memref<16x256xf32, #tpu.memory_space<vmem>>, vector<2x256xf32>
    %c12 = arith.constant 12 : index
    %c0_20 = arith.constant 0 : index
    %40 = vector.load %arg10[%c12, %c0_20] : memref<16x256xf32, #tpu.memory_space<vmem>>, vector<2x256xf32>
    %41 = arith.select %4, %39, %40 : vector<2x256xi1>, vector<2x256xf32>
    %cst_21 = arith.constant dense<0.000000e+00> : vector<2x256xf32>
    %42 = tpu.matmul %34, %12, %cst_21 {dimension_numbers = #tpu.dot_dimension_numbers<[1], [0], [0], [1], [0, 0, 1, 1], [], []>} : vector<2x64xf32>, vector<64x256xf32>, vector<2x256xf32> -> vector<2x256xf32>
    %43 = arith.addf %41, %42 : vector<2x256xf32>
    %44 = arith.negf %43 : vector<2x256xf32>
    %45 = math.exp %44 : vector<2x256xf32>
    %cst_22 = arith.constant 1.000000e+00 : f32
    %46 = vector.broadcast %cst_22 : f32 to vector<2x256xf32>
    %47 = arith.addf %46, %45 : vector<2x256xf32>
    %48 = arith.divf %46, %47 : vector<2x256xf32>
    %49 = math.tanh %43 : vector<2x256xf32>
    %50 = vector.extract_strided_slice %48 {offsets = [0, 0], sizes = [2, 64], strides = [1, 1]} : vector<2x256xf32> to vector<2x64xf32>
    %51 = vector.extract_strided_slice %48 {offsets = [0, 64], sizes = [2, 64], strides = [1, 1]} : vector<2x256xf32> to vector<2x64xf32>
    %52 = vector.extract_strided_slice %49 {offsets = [0, 128], sizes = [2, 64], strides = [1, 1]} : vector<2x256xf32> to vector<2x64xf32>
    %53 = vector.extract_strided_slice %48 {offsets = [0, 192], sizes = [2, 64], strides = [1, 1]} : vector<2x256xf32> to vector<2x64xf32>
    %54 = arith.mulf %51, %32 : vector<2x64xf32>
    %55 = arith.mulf %50, %52 : vector<2x64xf32>
    %56 = arith.addf %54, %55 : vector<2x64xf32>
    %57 = math.tanh %56 : vector<2x64xf32>
    %58 = arith.mulf %53, %57 : vector<2x64xf32>
    %59 = vector.extract_strided_slice %58 {offsets = [0, 0], sizes = [2, 32], strides = [1, 1]} : vector<2x64xf32> to vector<2x32xf32>
    %c2_23 = arith.constant 2 : index
    %c0_24 = arith.constant 0 : index
    %60 = vector.load %arg9[%c2_23, %c0_24] : memref<16x64xf32, #tpu.memory_space<vmem>>, vector<2x32xf32>
    tpu.vector_store %arg9[%c2_23, %c0_24], %59 {strides = array<i32>} : memref<16x64xf32, #tpu.memory_space<vmem>>, vector<2x32xf32>,
    %61 = vector.extract_strided_slice %58 {offsets = [0, 32], sizes = [2, 32], strides = [1, 1]} : vector<2x64xf32> to vector<2x32xf32>
    %c12_25 = arith.constant 12 : index
    %c32_26 = arith.constant 32 : index
    %62 = vector.load %arg9[%c12_25, %c32_26] : memref<16x64xf32, #tpu.memory_space<vmem>>, vector<2x32xf32>
    tpu.vector_store %arg9[%c12_25, %c32_26], %61 {strides = array<i32>} : memref<16x64xf32, #tpu.memory_space<vmem>>, vector<2x32xf32>,
    %c4 = arith.constant 4 : index
    %c0_27 = arith.constant 0 : index
    %63 = vector.load %arg10[%c4, %c0_27] : memref<16x256xf32, #tpu.memory_space<vmem>>, vector<2x256xf32>
    %c10 = arith.constant 10 : index
    %c0_28 = arith.constant 0 : index
    %64 = vector.load %arg10[%c10, %c0_28] : memref<16x256xf32, #tpu.memory_space<vmem>>, vector<2x256xf32>
    %65 = arith.select %4, %63, %64 : vector<2x256xi1>, vector<2x256xf32>
    %cst_29 = arith.constant dense<0.000000e+00> : vector<2x256xf32>
    %66 = tpu.matmul %58, %12, %cst_29 {dimension_numbers = #tpu.dot_dimension_numbers<[1], [0], [0], [1], [0, 0, 1, 1], [], []>} : vector<2x64xf32>, vector<64x256xf32>, vector<2x256xf32> -> vector<2x256xf32>
    %67 = arith.addf %65, %66 : vector<2x256xf32>
    %68 = arith.negf %67 : vector<2x256xf32>
    %69 = math.exp %68 : vector<2x256xf32>
    %cst_30 = arith.constant 1.000000e+00 : f32
    %70 = vector.broadcast %cst_30 : f32 to vector<2x256xf32>
    %71 = arith.addf %70, %69 : vector<2x256xf32>
    %72 = arith.divf %70, %71 : vector<2x256xf32>
    %73 = math.tanh %67 : vector<2x256xf32>
    %74 = vector.extract_strided_slice %72 {offsets = [0, 0], sizes = [2, 64], strides = [1, 1]} : vector<2x256xf32> to vector<2x64xf32>
    %75 = vector.extract_strided_slice %72 {offsets = [0, 64], sizes = [2, 64], strides = [1, 1]} : vector<2x256xf32> to vector<2x64xf32>
    %76 = vector.extract_strided_slice %73 {offsets = [0, 128], sizes = [2, 64], strides = [1, 1]} : vector<2x256xf32> to vector<2x64xf32>
    %77 = vector.extract_strided_slice %72 {offsets = [0, 192], sizes = [2, 64], strides = [1, 1]} : vector<2x256xf32> to vector<2x64xf32>
    %78 = arith.mulf %75, %56 : vector<2x64xf32>
    %79 = arith.mulf %74, %76 : vector<2x64xf32>
    %80 = arith.addf %78, %79 : vector<2x64xf32>
    %81 = math.tanh %80 : vector<2x64xf32>
    %82 = arith.mulf %77, %81 : vector<2x64xf32>
    %83 = vector.extract_strided_slice %82 {offsets = [0, 0], sizes = [2, 32], strides = [1, 1]} : vector<2x64xf32> to vector<2x32xf32>
    %c4_31 = arith.constant 4 : index
    %c0_32 = arith.constant 0 : index
    %84 = vector.load %arg9[%c4_31, %c0_32] : memref<16x64xf32, #tpu.memory_space<vmem>>, vector<2x32xf32>
    tpu.vector_store %arg9[%c4_31, %c0_32], %83 {strides = array<i32>} : memref<16x64xf32, #tpu.memory_space<vmem>>, vector<2x32xf32>,
    %85 = vector.extract_strided_slice %82 {offsets = [0, 32], sizes = [2, 32], strides = [1, 1]} : vector<2x64xf32> to vector<2x32xf32>
    %c10_33 = arith.constant 10 : index
    %c32_34 = arith.constant 32 : index
    %86 = vector.load %arg9[%c10_33, %c32_34] : memref<16x64xf32, #tpu.memory_space<vmem>>, vector<2x32xf32>
    tpu.vector_store %arg9[%c10_33, %c32_34], %85 {strides = array<i32>} : memref<16x64xf32, #tpu.memory_space<vmem>>, vector<2x32xf32>,
    %c6 = arith.constant 6 : index
    %c0_35 = arith.constant 0 : index
    %87 = vector.load %arg10[%c6, %c0_35] : memref<16x256xf32, #tpu.memory_space<vmem>>, vector<2x256xf32>
    %c8 = arith.constant 8 : index
    %c0_36 = arith.constant 0 : index
    %88 = vector.load %arg10[%c8, %c0_36] : memref<16x256xf32, #tpu.memory_space<vmem>>, vector<2x256xf32>
    %89 = arith.select %4, %87, %88 : vector<2x256xi1>, vector<2x256xf32>
    %cst_37 = arith.constant dense<0.000000e+00> : vector<2x256xf32>
    %90 = tpu.matmul %82, %12, %cst_37 {dimension_numbers = #tpu.dot_dimension_numbers<[1], [0], [0], [1], [0, 0, 1, 1], [], []>} : vector<2x64xf32>, vector<64x256xf32>, vector<2x256xf32> -> vector<2x256xf32>
    %91 = arith.addf %89, %90 : vector<2x256xf32>
    %92 = arith.negf %91 : vector<2x256xf32>
    %93 = math.exp %92 : vector<2x256xf32>
    %cst_38 = arith.constant 1.000000e+00 : f32
    %94 = vector.broadcast %cst_38 : f32 to vector<2x256xf32>
    %95 = arith.addf %94, %93 : vector<2x256xf32>
    %96 = arith.divf %94, %95 : vector<2x256xf32>
    %97 = math.tanh %91 : vector<2x256xf32>
    %98 = vector.extract_strided_slice %96 {offsets = [0, 0], sizes = [2, 64], strides = [1, 1]} : vector<2x256xf32> to vector<2x64xf32>
    %99 = vector.extract_strided_slice %96 {offsets = [0, 64], sizes = [2, 64], strides = [1, 1]} : vector<2x256xf32> to vector<2x64xf32>
    %100 = vector.extract_strided_slice %97 {offsets = [0, 128], sizes = [2, 64], strides = [1, 1]} : vector<2x256xf32> to vector<2x64xf32>
    %101 = vector.extract_strided_slice %96 {offsets = [0, 192], sizes = [2, 64], strides = [1, 1]} : vector<2x256xf32> to vector<2x64xf32>
    %102 = arith.mulf %99, %80 : vector<2x64xf32>
    %103 = arith.mulf %98, %100 : vector<2x64xf32>
    %104 = arith.addf %102, %103 : vector<2x64xf32>
    %105 = math.tanh %104 : vector<2x64xf32>
    %106 = arith.mulf %101, %105 : vector<2x64xf32>
    %107 = vector.extract_strided_slice %106 {offsets = [0, 0], sizes = [2, 32], strides = [1, 1]} : vector<2x64xf32> to vector<2x32xf32>
    %c6_39 = arith.constant 6 : index
    %c0_40 = arith.constant 0 : index
    %108 = vector.load %arg9[%c6_39, %c0_40] : memref<16x64xf32, #tpu.memory_space<vmem>>, vector<2x32xf32>
    tpu.vector_store %arg9[%c6_39, %c0_40], %107 {strides = array<i32>} : memref<16x64xf32, #tpu.memory_space<vmem>>, vector<2x32xf32>,
    %109 = vector.extract_strided_slice %106 {offsets = [0, 32], sizes = [2, 32], strides = [1, 1]} : vector<2x64xf32> to vector<2x32xf32>
    %c8_41 = arith.constant 8 : index
    %c32_42 = arith.constant 32 : index
    %110 = vector.load %arg9[%c8_41, %c32_42] : memref<16x64xf32, #tpu.memory_space<vmem>>, vector<2x32xf32>
    tpu.vector_store %arg9[%c8_41, %c32_42], %109 {strides = array<i32>} : memref<16x64xf32, #tpu.memory_space<vmem>>, vector<2x32xf32>,
    %c8_43 = arith.constant 8 : index
    %c0_44 = arith.constant 0 : index
    %111 = vector.load %arg10[%c8_43, %c0_44] : memref<16x256xf32, #tpu.memory_space<vmem>>, vector<2x256xf32>
    %c6_45 = arith.constant 6 : index
    %c0_46 = arith.constant 0 : index
    %112 = vector.load %arg10[%c6_45, %c0_46] : memref<16x256xf32, #tpu.memory_space<vmem>>, vector<2x256xf32>
    %113 = arith.select %4, %111, %112 : vector<2x256xi1>, vector<2x256xf32>
    %cst_47 = arith.constant dense<0.000000e+00> : vector<2x256xf32>
    %114 = tpu.matmul %106, %12, %cst_47 {dimension_numbers = #tpu.dot_dimension_numbers<[1], [0], [0], [1], [0, 0, 1, 1], [], []>} : vector<2x64xf32>, vector<64x256xf32>, vector<2x256xf32> -> vector<2x256xf32>
    %115 = arith.addf %113, %114 : vector<2x256xf32>
    %116 = arith.negf %115 : vector<2x256xf32>
    %117 = math.exp %116 : vector<2x256xf32>
    %cst_48 = arith.constant 1.000000e+00 : f32
    %118 = vector.broadcast %cst_48 : f32 to vector<2x256xf32>
    %119 = arith.addf %118, %117 : vector<2x256xf32>
    %120 = arith.divf %118, %119 : vector<2x256xf32>
    %121 = math.tanh %115 : vector<2x256xf32>
    %122 = vector.extract_strided_slice %120 {offsets = [0, 0], sizes = [2, 64], strides = [1, 1]} : vector<2x256xf32> to vector<2x64xf32>
    %123 = vector.extract_strided_slice %120 {offsets = [0, 64], sizes = [2, 64], strides = [1, 1]} : vector<2x256xf32> to vector<2x64xf32>
    %124 = vector.extract_strided_slice %121 {offsets = [0, 128], sizes = [2, 64], strides = [1, 1]} : vector<2x256xf32> to vector<2x64xf32>
    %125 = vector.extract_strided_slice %120 {offsets = [0, 192], sizes = [2, 64], strides = [1, 1]} : vector<2x256xf32> to vector<2x64xf32>
    %126 = arith.mulf %123, %104 : vector<2x64xf32>
    %127 = arith.mulf %122, %124 : vector<2x64xf32>
    %128 = arith.addf %126, %127 : vector<2x64xf32>
    %129 = math.tanh %128 : vector<2x64xf32>
    %130 = arith.mulf %125, %129 : vector<2x64xf32>
    %131 = vector.extract_strided_slice %130 {offsets = [0, 0], sizes = [2, 32], strides = [1, 1]} : vector<2x64xf32> to vector<2x32xf32>
    %c8_49 = arith.constant 8 : index
    %c0_50 = arith.constant 0 : index
    %132 = vector.load %arg9[%c8_49, %c0_50] : memref<16x64xf32, #tpu.memory_space<vmem>>, vector<2x32xf32>
    tpu.vector_store %arg9[%c8_49, %c0_50], %131 {strides = array<i32>} : memref<16x64xf32, #tpu.memory_space<vmem>>, vector<2x32xf32>,
    %133 = vector.extract_strided_slice %130 {offsets = [0, 32], sizes = [2, 32], strides = [1, 1]} : vector<2x64xf32> to vector<2x32xf32>
    %c6_51 = arith.constant 6 : index
    %c32_52 = arith.constant 32 : index
    %134 = vector.load %arg9[%c6_51, %c32_52] : memref<16x64xf32, #tpu.memory_space<vmem>>, vector<2x32xf32>
    tpu.vector_store %arg9[%c6_51, %c32_52], %133 {strides = array<i32>} : memref<16x64xf32, #tpu.memory_space<vmem>>, vector<2x32xf32>,
    %c10_53 = arith.constant 10 : index
    %c0_54 = arith.constant 0 : index
    %135 = vector.load %arg10[%c10_53, %c0_54] : memref<16x256xf32, #tpu.memory_space<vmem>>, vector<2x256xf32>
    %c4_55 = arith.constant 4 : index
    %c0_56 = arith.constant 0 : index
    %136 = vector.load %arg10[%c4_55, %c0_56] : memref<16x256xf32, #tpu.memory_space<vmem>>, vector<2x256xf32>
    %137 = arith.select %4, %135, %136 : vector<2x256xi1>, vector<2x256xf32>
    %cst_57 = arith.constant dense<0.000000e+00> : vector<2x256xf32>
    %138 = tpu.matmul %130, %12, %cst_57 {dimension_numbers = #tpu.dot_dimension_numbers<[1], [0], [0], [1], [0, 0, 1, 1], [], []>} : vector<2x64xf32>, vector<64x256xf32>, vector<2x256xf32> -> vector<2x256xf32>
    %139 = arith.addf %137, %138 : vector<2x256xf32>
    %140 = arith.negf %139 : vector<2x256xf32>
    %141 = math.exp %140 : vector<2x256xf32>
    %cst_58 = arith.constant 1.000000e+00 : f32
    %142 = vector.broadcast %cst_58 : f32 to vector<2x256xf32>
    %143 = arith.addf %142, %141 : vector<2x256xf32>
    %144 = arith.divf %142, %143 : vector<2x256xf32>
    %145 = math.tanh %139 : vector<2x256xf32>
    %146 = vector.extract_strided_slice %144 {offsets = [0, 0], sizes = [2, 64], strides = [1, 1]} : vector<2x256xf32> to vector<2x64xf32>
    %147 = vector.extract_strided_slice %144 {offsets = [0, 64], sizes = [2, 64], strides = [1, 1]} : vector<2x256xf32> to vector<2x64xf32>
    %148 = vector.extract_strided_slice %145 {offsets = [0, 128], sizes = [2, 64], strides = [1, 1]} : vector<2x256xf32> to vector<2x64xf32>
    %149 = vector.extract_strided_slice %144 {offsets = [0, 192], sizes = [2, 64], strides = [1, 1]} : vector<2x256xf32> to vector<2x64xf32>
    %150 = arith.mulf %147, %128 : vector<2x64xf32>
    %151 = arith.mulf %146, %148 : vector<2x64xf32>
    %152 = arith.addf %150, %151 : vector<2x64xf32>
    %153 = math.tanh %152 : vector<2x64xf32>
    %154 = arith.mulf %149, %153 : vector<2x64xf32>
    %155 = vector.extract_strided_slice %154 {offsets = [0, 0], sizes = [2, 32], strides = [1, 1]} : vector<2x64xf32> to vector<2x32xf32>
    %c10_59 = arith.constant 10 : index
    %c0_60 = arith.constant 0 : index
    %156 = vector.load %arg9[%c10_59, %c0_60] : memref<16x64xf32, #tpu.memory_space<vmem>>, vector<2x32xf32>
    tpu.vector_store %arg9[%c10_59, %c0_60], %155 {strides = array<i32>} : memref<16x64xf32, #tpu.memory_space<vmem>>, vector<2x32xf32>,
    %157 = vector.extract_strided_slice %154 {offsets = [0, 32], sizes = [2, 32], strides = [1, 1]} : vector<2x64xf32> to vector<2x32xf32>
    %c4_61 = arith.constant 4 : index
    %c32_62 = arith.constant 32 : index
    %158 = vector.load %arg9[%c4_61, %c32_62] : memref<16x64xf32, #tpu.memory_space<vmem>>, vector<2x32xf32>
    tpu.vector_store %arg9[%c4_61, %c32_62], %157 {strides = array<i32>} : memref<16x64xf32, #tpu.memory_space<vmem>>, vector<2x32xf32>,
    %c12_63 = arith.constant 12 : index
    %c0_64 = arith.constant 0 : index
    %159 = vector.load %arg10[%c12_63, %c0_64] : memref<16x256xf32, #tpu.memory_space<vmem>>, vector<2x256xf32>
    %c2_65 = arith.constant 2 : index
    %c0_66 = arith.constant 0 : index
    %160 = vector.load %arg10[%c2_65, %c0_66] : memref<16x256xf32, #tpu.memory_space<vmem>>, vector<2x256xf32>
    %161 = arith.select %4, %159, %160 : vector<2x256xi1>, vector<2x256xf32>
    %cst_67 = arith.constant dense<0.000000e+00> : vector<2x256xf32>
    %162 = tpu.matmul %154, %12, %cst_67 {dimension_numbers = #tpu.dot_dimension_numbers<[1], [0], [0], [1], [0, 0, 1, 1], [], []>} : vector<2x64xf32>, vector<64x256xf32>, vector<2x256xf32> -> vector<2x256xf32>
    %163 = arith.addf %161, %162 : vector<2x256xf32>
    %164 = arith.negf %163 : vector<2x256xf32>
    %165 = math.exp %164 : vector<2x256xf32>
    %cst_68 = arith.constant 1.000000e+00 : f32
    %166 = vector.broadcast %cst_68 : f32 to vector<2x256xf32>
    %167 = arith.addf %166, %165 : vector<2x256xf32>
    %168 = arith.divf %166, %167 : vector<2x256xf32>
    %169 = math.tanh %163 : vector<2x256xf32>
    %170 = vector.extract_strided_slice %168 {offsets = [0, 0], sizes = [2, 64], strides = [1, 1]} : vector<2x256xf32> to vector<2x64xf32>
    %171 = vector.extract_strided_slice %168 {offsets = [0, 64], sizes = [2, 64], strides = [1, 1]} : vector<2x256xf32> to vector<2x64xf32>
    %172 = vector.extract_strided_slice %169 {offsets = [0, 128], sizes = [2, 64], strides = [1, 1]} : vector<2x256xf32> to vector<2x64xf32>
    %173 = vector.extract_strided_slice %168 {offsets = [0, 192], sizes = [2, 64], strides = [1, 1]} : vector<2x256xf32> to vector<2x64xf32>
    %174 = arith.mulf %171, %152 : vector<2x64xf32>
    %175 = arith.mulf %170, %172 : vector<2x64xf32>
    %176 = arith.addf %174, %175 : vector<2x64xf32>
    %177 = math.tanh %176 : vector<2x64xf32>
    %178 = arith.mulf %173, %177 : vector<2x64xf32>
    %179 = vector.extract_strided_slice %178 {offsets = [0, 0], sizes = [2, 32], strides = [1, 1]} : vector<2x64xf32> to vector<2x32xf32>
    %c12_69 = arith.constant 12 : index
    %c0_70 = arith.constant 0 : index
    %180 = vector.load %arg9[%c12_69, %c0_70] : memref<16x64xf32, #tpu.memory_space<vmem>>, vector<2x32xf32>
    tpu.vector_store %arg9[%c12_69, %c0_70], %179 {strides = array<i32>} : memref<16x64xf32, #tpu.memory_space<vmem>>, vector<2x32xf32>,
    %181 = vector.extract_strided_slice %178 {offsets = [0, 32], sizes = [2, 32], strides = [1, 1]} : vector<2x64xf32> to vector<2x32xf32>
    %c2_71 = arith.constant 2 : index
    %c32_72 = arith.constant 32 : index
    %182 = vector.load %arg9[%c2_71, %c32_72] : memref<16x64xf32, #tpu.memory_space<vmem>>, vector<2x32xf32>
    tpu.vector_store %arg9[%c2_71, %c32_72], %181 {strides = array<i32>} : memref<16x64xf32, #tpu.memory_space<vmem>>, vector<2x32xf32>,
    %c14_73 = arith.constant 14 : index
    %c0_74 = arith.constant 0 : index
    %183 = vector.load %arg10[%c14_73, %c0_74] : memref<16x256xf32, #tpu.memory_space<vmem>>, vector<2x256xf32>
    %c0_75 = arith.constant 0 : index
    %c0_76 = arith.constant 0 : index
    %184 = vector.load %arg10[%c0_75, %c0_76] : memref<16x256xf32, #tpu.memory_space<vmem>>, vector<2x256xf32>
    %185 = arith.select %4, %183, %184 : vector<2x256xi1>, vector<2x256xf32>
    %cst_77 = arith.constant dense<0.000000e+00> : vector<2x256xf32>
    %186 = tpu.matmul %178, %12, %cst_77 {dimension_numbers = #tpu.dot_dimension_numbers<[1], [0], [0], [1], [0, 0, 1, 1], [], []>} : vector<2x64xf32>, vector<64x256xf32>, vector<2x256xf32> -> vector<2x256xf32>
    %187 = arith.addf %185, %186 : vector<2x256xf32>
    %188 = arith.negf %187 : vector<2x256xf32>
    %189 = math.exp %188 : vector<2x256xf32>
    %cst_78 = arith.constant 1.000000e+00 : f32
    %190 = vector.broadcast %cst_78 : f32 to vector<2x256xf32>
    %191 = arith.addf %190, %189 : vector<2x256xf32>
    %192 = arith.divf %190, %191 : vector<2x256xf32>
    %193 = math.tanh %187 : vector<2x256xf32>
    %194 = vector.extract_strided_slice %192 {offsets = [0, 0], sizes = [2, 64], strides = [1, 1]} : vector<2x256xf32> to vector<2x64xf32>
    %195 = vector.extract_strided_slice %192 {offsets = [0, 64], sizes = [2, 64], strides = [1, 1]} : vector<2x256xf32> to vector<2x64xf32>
    %196 = vector.extract_strided_slice %193 {offsets = [0, 128], sizes = [2, 64], strides = [1, 1]} : vector<2x256xf32> to vector<2x64xf32>
    %197 = vector.extract_strided_slice %192 {offsets = [0, 192], sizes = [2, 64], strides = [1, 1]} : vector<2x256xf32> to vector<2x64xf32>
    %198 = arith.mulf %195, %176 : vector<2x64xf32>
    %199 = arith.mulf %194, %196 : vector<2x64xf32>
    %200 = arith.addf %198, %199 : vector<2x64xf32>
    %201 = math.tanh %200 : vector<2x64xf32>
    %202 = arith.mulf %197, %201 : vector<2x64xf32>
    %203 = vector.extract_strided_slice %202 {offsets = [0, 0], sizes = [2, 32], strides = [1, 1]} : vector<2x64xf32> to vector<2x32xf32>
    %c14_79 = arith.constant 14 : index
    %c0_80 = arith.constant 0 : index
    %204 = vector.load %arg9[%c14_79, %c0_80] : memref<16x64xf32, #tpu.memory_space<vmem>>, vector<2x32xf32>
    tpu.vector_store %arg9[%c14_79, %c0_80], %203 {strides = array<i32>} : memref<16x64xf32, #tpu.memory_space<vmem>>, vector<2x32xf32>,
    %205 = vector.extract_strided_slice %202 {offsets = [0, 32], sizes = [2, 32], strides = [1, 1]} : vector<2x64xf32> to vector<2x32xf32>
    %c0_81 = arith.constant 0 : index
    %c32_82 = arith.constant 32 : index
    %206 = vector.load %arg9[%c0_81, %c32_82] : memref<16x64xf32, #tpu.memory_space<vmem>>, vector<2x32xf32>
    tpu.vector_store %arg9[%c0_81, %c32_82], %205 {strides = array<i32>} : memref<16x64xf32, #tpu.memory_space<vmem>>, vector<2x32xf32>,
    %c0_83 = arith.constant 0 : index
    %c0_84 = arith.constant 0 : index
    %207 = vector.load %arg9[%c0_83, %c0_84] : memref<16x64xf32, #tpu.memory_space<vmem>>, vector<16x64xf32>
    %c0_85 = arith.constant 0 : index
    %c0_86 = arith.constant 0 : index
    %208 = vector.load %arg5[%c0_85, %c0_86] : memref<64x256xf32, #tpu.memory_space<vmem>>, vector<64x256xf32>
    %cst_87 = arith.constant dense<0.000000e+00> : vector<16x256xf32>
    %209 = tpu.matmul %207, %208, %cst_87 {dimension_numbers = #tpu.dot_dimension_numbers<[1], [0], [0], [1], [0, 0, 1, 1], [], []>} : vector<16x64xf32>, vector<64x256xf32>, vector<16x256xf32> -> vector<16x256xf32>
    %c0_88 = arith.constant 0 : index
    %c0_89 = arith.constant 0 : index
    %210 = vector.load %arg7[%c0_88, %c0_89] : memref<1x256xf32, #tpu.memory_space<vmem>>, vector<1x256xf32>
    %211 = vector.broadcast %210 : vector<1x256xf32> to vector<16x256xf32>
    %212 = arith.addf %209, %211 : vector<16x256xf32>
    %c0_90 = arith.constant 0 : index
    %c0_91 = arith.constant 0 : index
    %213 = vector.load %arg10[%c0_90, %c0_91] : memref<16x256xf32, #tpu.memory_space<vmem>>, vector<16x256xf32>
    tpu.vector_store %arg10[%c0_90, %c0_91], %212 {strides = array<i32>} : memref<16x256xf32, #tpu.memory_space<vmem>>, vector<16x256xf32>,
    %c0_92 = arith.constant 0 : index
    %c0_93 = arith.constant 0 : index
    %214 = vector.load %arg6[%c0_92, %c0_93] : memref<64x256xf32, #tpu.memory_space<vmem>>, vector<64x256xf32>
    %cst_94 = arith.constant 0.000000e+00 : f32
    %215 = vector.broadcast %cst_94 : f32 to vector<2x64xf32>
    %cst_95 = arith.constant 0.000000e+00 : f32
    %216 = vector.broadcast %cst_95 : f32 to vector<2x64xf32>
    %c0_96 = arith.constant 0 : index
    %c0_97 = arith.constant 0 : index
    %217 = vector.load %arg10[%c0_96, %c0_97] : memref<16x256xf32, #tpu.memory_space<vmem>>, vector<2x256xf32>
    %c14_98 = arith.constant 14 : index
    %c0_99 = arith.constant 0 : index
    %218 = vector.load %arg10[%c14_98, %c0_99] : memref<16x256xf32, #tpu.memory_space<vmem>>, vector<2x256xf32>
    %219 = arith.select %4, %217, %218 : vector<2x256xi1>, vector<2x256xf32>
    %cst_100 = arith.constant dense<0.000000e+00> : vector<2x256xf32>
    %220 = tpu.matmul %215, %214, %cst_100 {dimension_numbers = #tpu.dot_dimension_numbers<[1], [0], [0], [1], [0, 0, 1, 1], [], []>} : vector<2x64xf32>, vector<64x256xf32>, vector<2x256xf32> -> vector<2x256xf32>
    %221 = arith.addf %219, %220 : vector<2x256xf32>
    %222 = arith.negf %221 : vector<2x256xf32>
    %223 = math.exp %222 : vector<2x256xf32>
    %cst_101 = arith.constant 1.000000e+00 : f32
    %224 = vector.broadcast %cst_101 : f32 to vector<2x256xf32>
    %225 = arith.addf %224, %223 : vector<2x256xf32>
    %226 = arith.divf %224, %225 : vector<2x256xf32>
    %227 = math.tanh %221 : vector<2x256xf32>
    %228 = vector.extract_strided_slice %226 {offsets = [0, 0], sizes = [2, 64], strides = [1, 1]} : vector<2x256xf32> to vector<2x64xf32>
    %229 = vector.extract_strided_slice %226 {offsets = [0, 64], sizes = [2, 64], strides = [1, 1]} : vector<2x256xf32> to vector<2x64xf32>
    %230 = vector.extract_strided_slice %227 {offsets = [0, 128], sizes = [2, 64], strides = [1, 1]} : vector<2x256xf32> to vector<2x64xf32>
    %231 = vector.extract_strided_slice %226 {offsets = [0, 192], sizes = [2, 64], strides = [1, 1]} : vector<2x256xf32> to vector<2x64xf32>
    %232 = arith.mulf %229, %216 : vector<2x64xf32>
    %233 = arith.mulf %228, %230 : vector<2x64xf32>
    %234 = arith.addf %232, %233 : vector<2x64xf32>
    %235 = math.tanh %234 : vector<2x64xf32>
    %236 = arith.mulf %231, %235 : vector<2x64xf32>
    %237 = vector.extract_strided_slice %236 {offsets = [0, 0], sizes = [2, 32], strides = [1, 1]} : vector<2x64xf32> to vector<2x32xf32>
    %c0_102 = arith.constant 0 : index
    %c0_103 = arith.constant 0 : index
    %238 = vector.load %arg8[%c0_102, %c0_103] : memref<16x64xf32, #tpu.memory_space<vmem>>, vector<2x32xf32>
    tpu.vector_store %arg8[%c0_102, %c0_103], %237 {strides = array<i32>} : memref<16x64xf32, #tpu.memory_space<vmem>>, vector<2x32xf32>,
    %239 = vector.extract_strided_slice %236 {offsets = [0, 32], sizes = [2, 32], strides = [1, 1]} : vector<2x64xf32> to vector<2x32xf32>
    %c14_104 = arith.constant 14 : index
    %c32_105 = arith.constant 32 : index
    %240 = vector.load %arg8[%c14_104, %c32_105] : memref<16x64xf32, #tpu.memory_space<vmem>>, vector<2x32xf32>
    tpu.vector_store %arg8[%c14_104, %c32_105], %239 {strides = array<i32>} : memref<16x64xf32, #tpu.memory_space<vmem>>, vector<2x32xf32>,
    %c2_106 = arith.constant 2 : index
    %c0_107 = arith.constant 0 : index
    %241 = vector.load %arg10[%c2_106, %c0_107] : memref<16x256xf32, #tpu.memory_space<vmem>>, vector<2x256xf32>
    %c12_108 = arith.constant 12 : index
    %c0_109 = arith.constant 0 : index
    %242 = vector.load %arg10[%c12_108, %c0_109] : memref<16x256xf32, #tpu.memory_space<vmem>>, vector<2x256xf32>
    %243 = arith.select %4, %241, %242 : vector<2x256xi1>, vector<2x256xf32>
    %cst_110 = arith.constant dense<0.000000e+00> : vector<2x256xf32>
    %244 = tpu.matmul %236, %214, %cst_110 {dimension_numbers = #tpu.dot_dimension_numbers<[1], [0], [0], [1], [0, 0, 1, 1], [], []>} : vector<2x64xf32>, vector<64x256xf32>, vector<2x256xf32> -> vector<2x256xf32>
    %245 = arith.addf %243, %244 : vector<2x256xf32>
    %246 = arith.negf %245 : vector<2x256xf32>
    %247 = math.exp %246 : vector<2x256xf32>
    %cst_111 = arith.constant 1.000000e+00 : f32
    %248 = vector.broadcast %cst_111 : f32 to vector<2x256xf32>
    %249 = arith.addf %248, %247 : vector<2x256xf32>
    %250 = arith.divf %248, %249 : vector<2x256xf32>
    %251 = math.tanh %245 : vector<2x256xf32>
    %252 = vector.extract_strided_slice %250 {offsets = [0, 0], sizes = [2, 64], strides = [1, 1]} : vector<2x256xf32> to vector<2x64xf32>
    %253 = vector.extract_strided_slice %250 {offsets = [0, 64], sizes = [2, 64], strides = [1, 1]} : vector<2x256xf32> to vector<2x64xf32>
    %254 = vector.extract_strided_slice %251 {offsets = [0, 128], sizes = [2, 64], strides = [1, 1]} : vector<2x256xf32> to vector<2x64xf32>
    %255 = vector.extract_strided_slice %250 {offsets = [0, 192], sizes = [2, 64], strides = [1, 1]} : vector<2x256xf32> to vector<2x64xf32>
    %256 = arith.mulf %253, %234 : vector<2x64xf32>
    %257 = arith.mulf %252, %254 : vector<2x64xf32>
    %258 = arith.addf %256, %257 : vector<2x64xf32>
    %259 = math.tanh %258 : vector<2x64xf32>
    %260 = arith.mulf %255, %259 : vector<2x64xf32>
    %261 = vector.extract_strided_slice %260 {offsets = [0, 0], sizes = [2, 32], strides = [1, 1]} : vector<2x64xf32> to vector<2x32xf32>
    %c2_112 = arith.constant 2 : index
    %c0_113 = arith.constant 0 : index
    %262 = vector.load %arg8[%c2_112, %c0_113] : memref<16x64xf32, #tpu.memory_space<vmem>>, vector<2x32xf32>
    tpu.vector_store %arg8[%c2_112, %c0_113], %261 {strides = array<i32>} : memref<16x64xf32, #tpu.memory_space<vmem>>, vector<2x32xf32>,
    %263 = vector.extract_strided_slice %260 {offsets = [0, 32], sizes = [2, 32], strides = [1, 1]} : vector<2x64xf32> to vector<2x32xf32>
    %c12_114 = arith.constant 12 : index
    %c32_115 = arith.constant 32 : index
    %264 = vector.load %arg8[%c12_114, %c32_115] : memref<16x64xf32, #tpu.memory_space<vmem>>, vector<2x32xf32>
    tpu.vector_store %arg8[%c12_114, %c32_115], %263 {strides = array<i32>} : memref<16x64xf32, #tpu.memory_space<vmem>>, vector<2x32xf32>,
    %c4_116 = arith.constant 4 : index
    %c0_117 = arith.constant 0 : index
    %265 = vector.load %arg10[%c4_116, %c0_117] : memref<16x256xf32, #tpu.memory_space<vmem>>, vector<2x256xf32>
    %c10_118 = arith.constant 10 : index
    %c0_119 = arith.constant 0 : index
    %266 = vector.load %arg10[%c10_118, %c0_119] : memref<16x256xf32, #tpu.memory_space<vmem>>, vector<2x256xf32>
    %267 = arith.select %4, %265, %266 : vector<2x256xi1>, vector<2x256xf32>
    %cst_120 = arith.constant dense<0.000000e+00> : vector<2x256xf32>
    %268 = tpu.matmul %260, %214, %cst_120 {dimension_numbers = #tpu.dot_dimension_numbers<[1], [0], [0], [1], [0, 0, 1, 1], [], []>} : vector<2x64xf32>, vector<64x256xf32>, vector<2x256xf32> -> vector<2x256xf32>
    %269 = arith.addf %267, %268 : vector<2x256xf32>
    %270 = arith.negf %269 : vector<2x256xf32>
    %271 = math.exp %270 : vector<2x256xf32>
    %cst_121 = arith.constant 1.000000e+00 : f32
    %272 = vector.broadcast %cst_121 : f32 to vector<2x256xf32>
    %273 = arith.addf %272, %271 : vector<2x256xf32>
    %274 = arith.divf %272, %273 : vector<2x256xf32>
    %275 = math.tanh %269 : vector<2x256xf32>
    %276 = vector.extract_strided_slice %274 {offsets = [0, 0], sizes = [2, 64], strides = [1, 1]} : vector<2x256xf32> to vector<2x64xf32>
    %277 = vector.extract_strided_slice %274 {offsets = [0, 64], sizes = [2, 64], strides = [1, 1]} : vector<2x256xf32> to vector<2x64xf32>
    %278 = vector.extract_strided_slice %275 {offsets = [0, 128], sizes = [2, 64], strides = [1, 1]} : vector<2x256xf32> to vector<2x64xf32>
    %279 = vector.extract_strided_slice %274 {offsets = [0, 192], sizes = [2, 64], strides = [1, 1]} : vector<2x256xf32> to vector<2x64xf32>
    %280 = arith.mulf %277, %258 : vector<2x64xf32>
    %281 = arith.mulf %276, %278 : vector<2x64xf32>
    %282 = arith.addf %280, %281 : vector<2x64xf32>
    %283 = math.tanh %282 : vector<2x64xf32>
    %284 = arith.mulf %279, %283 : vector<2x64xf32>
    %285 = vector.extract_strided_slice %284 {offsets = [0, 0], sizes = [2, 32], strides = [1, 1]} : vector<2x64xf32> to vector<2x32xf32>
    %c4_122 = arith.constant 4 : index
    %c0_123 = arith.constant 0 : index
    %286 = vector.load %arg8[%c4_122, %c0_123] : memref<16x64xf32, #tpu.memory_space<vmem>>, vector<2x32xf32>
    tpu.vector_store %arg8[%c4_122, %c0_123], %285 {strides = array<i32>} : memref<16x64xf32, #tpu.memory_space<vmem>>, vector<2x32xf32>,
    %287 = vector.extract_strided_slice %284 {offsets = [0, 32], sizes = [2, 32], strides = [1, 1]} : vector<2x64xf32> to vector<2x32xf32>
    %c10_124 = arith.constant 10 : index
    %c32_125 = arith.constant 32 : index
    %288 = vector.load %arg8[%c10_124, %c32_125] : memref<16x64xf32, #tpu.memory_space<vmem>>, vector<2x32xf32>
    tpu.vector_store %arg8[%c10_124, %c32_125], %287 {strides = array<i32>} : memref<16x64xf32, #tpu.memory_space<vmem>>, vector<2x32xf32>,
    %c6_126 = arith.constant 6 : index
    %c0_127 = arith.constant 0 : index
    %289 = vector.load %arg10[%c6_126, %c0_127] : memref<16x256xf32, #tpu.memory_space<vmem>>, vector<2x256xf32>
    %c8_128 = arith.constant 8 : index
    %c0_129 = arith.constant 0 : index
    %290 = vector.load %arg10[%c8_128, %c0_129] : memref<16x256xf32, #tpu.memory_space<vmem>>, vector<2x256xf32>
    %291 = arith.select %4, %289, %290 : vector<2x256xi1>, vector<2x256xf32>
    %cst_130 = arith.constant dense<0.000000e+00> : vector<2x256xf32>
    %292 = tpu.matmul %284, %214, %cst_130 {dimension_numbers = #tpu.dot_dimension_numbers<[1], [0], [0], [1], [0, 0, 1, 1], [], []>} : vector<2x64xf32>, vector<64x256xf32>, vector<2x256xf32> -> vector<2x256xf32>
    %293 = arith.addf %291, %292 : vector<2x256xf32>
    %294 = arith.negf %293 : vector<2x256xf32>
    %295 = math.exp %294 : vector<2x256xf32>
    %cst_131 = arith.constant 1.000000e+00 : f32
    %296 = vector.broadcast %cst_131 : f32 to vector<2x256xf32>
    %297 = arith.addf %296, %295 : vector<2x256xf32>
    %298 = arith.divf %296, %297 : vector<2x256xf32>
    %299 = math.tanh %293 : vector<2x256xf32>
    %300 = vector.extract_strided_slice %298 {offsets = [0, 0], sizes = [2, 64], strides = [1, 1]} : vector<2x256xf32> to vector<2x64xf32>
    %301 = vector.extract_strided_slice %298 {offsets = [0, 64], sizes = [2, 64], strides = [1, 1]} : vector<2x256xf32> to vector<2x64xf32>
    %302 = vector.extract_strided_slice %299 {offsets = [0, 128], sizes = [2, 64], strides = [1, 1]} : vector<2x256xf32> to vector<2x64xf32>
    %303 = vector.extract_strided_slice %298 {offsets = [0, 192], sizes = [2, 64], strides = [1, 1]} : vector<2x256xf32> to vector<2x64xf32>
    %304 = arith.mulf %301, %282 : vector<2x64xf32>
    %305 = arith.mulf %300, %302 : vector<2x64xf32>
    %306 = arith.addf %304, %305 : vector<2x64xf32>
    %307 = math.tanh %306 : vector<2x64xf32>
    %308 = arith.mulf %303, %307 : vector<2x64xf32>
    %309 = vector.extract_strided_slice %308 {offsets = [0, 0], sizes = [2, 32], strides = [1, 1]} : vector<2x64xf32> to vector<2x32xf32>
    %c6_132 = arith.constant 6 : index
    %c0_133 = arith.constant 0 : index
    %310 = vector.load %arg8[%c6_132, %c0_133] : memref<16x64xf32, #tpu.memory_space<vmem>>, vector<2x32xf32>
    tpu.vector_store %arg8[%c6_132, %c0_133], %309 {strides = array<i32>} : memref<16x64xf32, #tpu.memory_space<vmem>>, vector<2x32xf32>,
    %311 = vector.extract_strided_slice %308 {offsets = [0, 32], sizes = [2, 32], strides = [1, 1]} : vector<2x64xf32> to vector<2x32xf32>
    %c8_134 = arith.constant 8 : index
    %c32_135 = arith.constant 32 : index
    %312 = vector.load %arg8[%c8_134, %c32_135] : memref<16x64xf32, #tpu.memory_space<vmem>>, vector<2x32xf32>
    tpu.vector_store %arg8[%c8_134, %c32_135], %311 {strides = array<i32>} : memref<16x64xf32, #tpu.memory_space<vmem>>, vector<2x32xf32>,
    %c8_136 = arith.constant 8 : index
    %c0_137 = arith.constant 0 : index
    %313 = vector.load %arg10[%c8_136, %c0_137] : memref<16x256xf32, #tpu.memory_space<vmem>>, vector<2x256xf32>
    %c6_138 = arith.constant 6 : index
    %c0_139 = arith.constant 0 : index
    %314 = vector.load %arg10[%c6_138, %c0_139] : memref<16x256xf32, #tpu.memory_space<vmem>>, vector<2x256xf32>
    %315 = arith.select %4, %313, %314 : vector<2x256xi1>, vector<2x256xf32>
    %cst_140 = arith.constant dense<0.000000e+00> : vector<2x256xf32>
    %316 = tpu.matmul %308, %214, %cst_140 {dimension_numbers = #tpu.dot_dimension_numbers<[1], [0], [0], [1], [0, 0, 1, 1], [], []>} : vector<2x64xf32>, vector<64x256xf32>, vector<2x256xf32> -> vector<2x256xf32>
    %317 = arith.addf %315, %316 : vector<2x256xf32>
    %318 = arith.negf %317 : vector<2x256xf32>
    %319 = math.exp %318 : vector<2x256xf32>
    %cst_141 = arith.constant 1.000000e+00 : f32
    %320 = vector.broadcast %cst_141 : f32 to vector<2x256xf32>
    %321 = arith.addf %320, %319 : vector<2x256xf32>
    %322 = arith.divf %320, %321 : vector<2x256xf32>
    %323 = math.tanh %317 : vector<2x256xf32>
    %324 = vector.extract_strided_slice %322 {offsets = [0, 0], sizes = [2, 64], strides = [1, 1]} : vector<2x256xf32> to vector<2x64xf32>
    %325 = vector.extract_strided_slice %322 {offsets = [0, 64], sizes = [2, 64], strides = [1, 1]} : vector<2x256xf32> to vector<2x64xf32>
    %326 = vector.extract_strided_slice %323 {offsets = [0, 128], sizes = [2, 64], strides = [1, 1]} : vector<2x256xf32> to vector<2x64xf32>
    %327 = vector.extract_strided_slice %322 {offsets = [0, 192], sizes = [2, 64], strides = [1, 1]} : vector<2x256xf32> to vector<2x64xf32>
    %328 = arith.mulf %325, %306 : vector<2x64xf32>
    %329 = arith.mulf %324, %326 : vector<2x64xf32>
    %330 = arith.addf %328, %329 : vector<2x64xf32>
    %331 = math.tanh %330 : vector<2x64xf32>
    %332 = arith.mulf %327, %331 : vector<2x64xf32>
    %333 = vector.extract_strided_slice %332 {offsets = [0, 0], sizes = [2, 32], strides = [1, 1]} : vector<2x64xf32> to vector<2x32xf32>
    %c8_142 = arith.constant 8 : index
    %c0_143 = arith.constant 0 : index
    %334 = vector.load %arg8[%c8_142, %c0_143] : memref<16x64xf32, #tpu.memory_space<vmem>>, vector<2x32xf32>
    tpu.vector_store %arg8[%c8_142, %c0_143], %333 {strides = array<i32>} : memref<16x64xf32, #tpu.memory_space<vmem>>, vector<2x32xf32>,
    %335 = vector.extract_strided_slice %332 {offsets = [0, 32], sizes = [2, 32], strides = [1, 1]} : vector<2x64xf32> to vector<2x32xf32>
    %c6_144 = arith.constant 6 : index
    %c32_145 = arith.constant 32 : index
    %336 = vector.load %arg8[%c6_144, %c32_145] : memref<16x64xf32, #tpu.memory_space<vmem>>, vector<2x32xf32>
    tpu.vector_store %arg8[%c6_144, %c32_145], %335 {strides = array<i32>} : memref<16x64xf32, #tpu.memory_space<vmem>>, vector<2x32xf32>,
    %c10_146 = arith.constant 10 : index
    %c0_147 = arith.constant 0 : index
    %337 = vector.load %arg10[%c10_146, %c0_147] : memref<16x256xf32, #tpu.memory_space<vmem>>, vector<2x256xf32>
    %c4_148 = arith.constant 4 : index
    %c0_149 = arith.constant 0 : index
    %338 = vector.load %arg10[%c4_148, %c0_149] : memref<16x256xf32, #tpu.memory_space<vmem>>, vector<2x256xf32>
    %339 = arith.select %4, %337, %338 : vector<2x256xi1>, vector<2x256xf32>
    %cst_150 = arith.constant dense<0.000000e+00> : vector<2x256xf32>
    %340 = tpu.matmul %332, %214, %cst_150 {dimension_numbers = #tpu.dot_dimension_numbers<[1], [0], [0], [1], [0, 0, 1, 1], [], []>} : vector<2x64xf32>, vector<64x256xf32>, vector<2x256xf32> -> vector<2x256xf32>
    %341 = arith.addf %339, %340 : vector<2x256xf32>
    %342 = arith.negf %341 : vector<2x256xf32>
    %343 = math.exp %342 : vector<2x256xf32>
    %cst_151 = arith.constant 1.000000e+00 : f32
    %344 = vector.broadcast %cst_151 : f32 to vector<2x256xf32>
    %345 = arith.addf %344, %343 : vector<2x256xf32>
    %346 = arith.divf %344, %345 : vector<2x256xf32>
    %347 = math.tanh %341 : vector<2x256xf32>
    %348 = vector.extract_strided_slice %346 {offsets = [0, 0], sizes = [2, 64], strides = [1, 1]} : vector<2x256xf32> to vector<2x64xf32>
    %349 = vector.extract_strided_slice %346 {offsets = [0, 64], sizes = [2, 64], strides = [1, 1]} : vector<2x256xf32> to vector<2x64xf32>
    %350 = vector.extract_strided_slice %347 {offsets = [0, 128], sizes = [2, 64], strides = [1, 1]} : vector<2x256xf32> to vector<2x64xf32>
    %351 = vector.extract_strided_slice %346 {offsets = [0, 192], sizes = [2, 64], strides = [1, 1]} : vector<2x256xf32> to vector<2x64xf32>
    %352 = arith.mulf %349, %330 : vector<2x64xf32>
    %353 = arith.mulf %348, %350 : vector<2x64xf32>
    %354 = arith.addf %352, %353 : vector<2x64xf32>
    %355 = math.tanh %354 : vector<2x64xf32>
    %356 = arith.mulf %351, %355 : vector<2x64xf32>
    %357 = vector.extract_strided_slice %356 {offsets = [0, 0], sizes = [2, 32], strides = [1, 1]} : vector<2x64xf32> to vector<2x32xf32>
    %c10_152 = arith.constant 10 : index
    %c0_153 = arith.constant 0 : index
    %358 = vector.load %arg8[%c10_152, %c0_153] : memref<16x64xf32, #tpu.memory_space<vmem>>, vector<2x32xf32>
    tpu.vector_store %arg8[%c10_152, %c0_153], %357 {strides = array<i32>} : memref<16x64xf32, #tpu.memory_space<vmem>>, vector<2x32xf32>,
    %359 = vector.extract_strided_slice %356 {offsets = [0, 32], sizes = [2, 32], strides = [1, 1]} : vector<2x64xf32> to vector<2x32xf32>
    %c4_154 = arith.constant 4 : index
    %c32_155 = arith.constant 32 : index
    %360 = vector.load %arg8[%c4_154, %c32_155] : memref<16x64xf32, #tpu.memory_space<vmem>>, vector<2x32xf32>
    tpu.vector_store %arg8[%c4_154, %c32_155], %359 {strides = array<i32>} : memref<16x64xf32, #tpu.memory_space<vmem>>, vector<2x32xf32>,
    %c12_156 = arith.constant 12 : index
    %c0_157 = arith.constant 0 : index
    %361 = vector.load %arg10[%c12_156, %c0_157] : memref<16x256xf32, #tpu.memory_space<vmem>>, vector<2x256xf32>
    %c2_158 = arith.constant 2 : index
    %c0_159 = arith.constant 0 : index
    %362 = vector.load %arg10[%c2_158, %c0_159] : memref<16x256xf32, #tpu.memory_space<vmem>>, vector<2x256xf32>
    %363 = arith.select %4, %361, %362 : vector<2x256xi1>, vector<2x256xf32>
    %cst_160 = arith.constant dense<0.000000e+00> : vector<2x256xf32>
    %364 = tpu.matmul %356, %214, %cst_160 {dimension_numbers = #tpu.dot_dimension_numbers<[1], [0], [0], [1], [0, 0, 1, 1], [], []>} : vector<2x64xf32>, vector<64x256xf32>, vector<2x256xf32> -> vector<2x256xf32>
    %365 = arith.addf %363, %364 : vector<2x256xf32>
    %366 = arith.negf %365 : vector<2x256xf32>
    %367 = math.exp %366 : vector<2x256xf32>
    %cst_161 = arith.constant 1.000000e+00 : f32
    %368 = vector.broadcast %cst_161 : f32 to vector<2x256xf32>
    %369 = arith.addf %368, %367 : vector<2x256xf32>
    %370 = arith.divf %368, %369 : vector<2x256xf32>
    %371 = math.tanh %365 : vector<2x256xf32>
    %372 = vector.extract_strided_slice %370 {offsets = [0, 0], sizes = [2, 64], strides = [1, 1]} : vector<2x256xf32> to vector<2x64xf32>
    %373 = vector.extract_strided_slice %370 {offsets = [0, 64], sizes = [2, 64], strides = [1, 1]} : vector<2x256xf32> to vector<2x64xf32>
    %374 = vector.extract_strided_slice %371 {offsets = [0, 128], sizes = [2, 64], strides = [1, 1]} : vector<2x256xf32> to vector<2x64xf32>
    %375 = vector.extract_strided_slice %370 {offsets = [0, 192], sizes = [2, 64], strides = [1, 1]} : vector<2x256xf32> to vector<2x64xf32>
    %376 = arith.mulf %373, %354 : vector<2x64xf32>
    %377 = arith.mulf %372, %374 : vector<2x64xf32>
    %378 = arith.addf %376, %377 : vector<2x64xf32>
    %379 = math.tanh %378 : vector<2x64xf32>
    %380 = arith.mulf %375, %379 : vector<2x64xf32>
    %381 = vector.extract_strided_slice %380 {offsets = [0, 0], sizes = [2, 32], strides = [1, 1]} : vector<2x64xf32> to vector<2x32xf32>
    %c12_162 = arith.constant 12 : index
    %c0_163 = arith.constant 0 : index
    %382 = vector.load %arg8[%c12_162, %c0_163] : memref<16x64xf32, #tpu.memory_space<vmem>>, vector<2x32xf32>
    tpu.vector_store %arg8[%c12_162, %c0_163], %381 {strides = array<i32>} : memref<16x64xf32, #tpu.memory_space<vmem>>, vector<2x32xf32>,
    %383 = vector.extract_strided_slice %380 {offsets = [0, 32], sizes = [2, 32], strides = [1, 1]} : vector<2x64xf32> to vector<2x32xf32>
    %c2_164 = arith.constant 2 : index
    %c32_165 = arith.constant 32 : index
    %384 = vector.load %arg8[%c2_164, %c32_165] : memref<16x64xf32, #tpu.memory_space<vmem>>, vector<2x32xf32>
    tpu.vector_store %arg8[%c2_164, %c32_165], %383 {strides = array<i32>} : memref<16x64xf32, #tpu.memory_space<vmem>>, vector<2x32xf32>,
    %c14_166 = arith.constant 14 : index
    %c0_167 = arith.constant 0 : index
    %385 = vector.load %arg10[%c14_166, %c0_167] : memref<16x256xf32, #tpu.memory_space<vmem>>, vector<2x256xf32>
    %c0_168 = arith.constant 0 : index
    %c0_169 = arith.constant 0 : index
    %386 = vector.load %arg10[%c0_168, %c0_169] : memref<16x256xf32, #tpu.memory_space<vmem>>, vector<2x256xf32>
    %387 = arith.select %4, %385, %386 : vector<2x256xi1>, vector<2x256xf32>
    %cst_170 = arith.constant dense<0.000000e+00> : vector<2x256xf32>
    %388 = tpu.matmul %380, %214, %cst_170 {dimension_numbers = #tpu.dot_dimension_numbers<[1], [0], [0], [1], [0, 0, 1, 1], [], []>} : vector<2x64xf32>, vector<64x256xf32>, vector<2x256xf32> -> vector<2x256xf32>
    %389 = arith.addf %387, %388 : vector<2x256xf32>
    %390 = arith.negf %389 : vector<2x256xf32>
    %391 = math.exp %390 : vector<2x256xf32>
    %cst_171 = arith.constant 1.000000e+00 : f32
    %392 = vector.broadcast %cst_171 : f32 to vector<2x256xf32>
    %393 = arith.addf %392, %391 : vector<2x256xf32>
    %394 = arith.divf %392, %393 : vector<2x256xf32>
    %395 = math.tanh %389 : vector<2x256xf32>
    %396 = vector.extract_strided_slice %394 {offsets = [0, 0], sizes = [2, 64], strides = [1, 1]} : vector<2x256xf32> to vector<2x64xf32>
    %397 = vector.extract_strided_slice %394 {offsets = [0, 64], sizes = [2, 64], strides = [1, 1]} : vector<2x256xf32> to vector<2x64xf32>
    %398 = vector.extract_strided_slice %395 {offsets = [0, 128], sizes = [2, 64], strides = [1, 1]} : vector<2x256xf32> to vector<2x64xf32>
    %399 = vector.extract_strided_slice %394 {offsets = [0, 192], sizes = [2, 64], strides = [1, 1]} : vector<2x256xf32> to vector<2x64xf32>
    %400 = arith.mulf %397, %378 : vector<2x64xf32>
    %401 = arith.mulf %396, %398 : vector<2x64xf32>
    %402 = arith.addf %400, %401 : vector<2x64xf32>
    %403 = math.tanh %402 : vector<2x64xf32>
    %404 = arith.mulf %399, %403 : vector<2x64xf32>
    %405 = vector.extract_strided_slice %404 {offsets = [0, 0], sizes = [2, 32], strides = [1, 1]} : vector<2x64xf32> to vector<2x32xf32>
    %c14_172 = arith.constant 14 : index
    %c0_173 = arith.constant 0 : index
    %406 = vector.load %arg8[%c14_172, %c0_173] : memref<16x64xf32, #tpu.memory_space<vmem>>, vector<2x32xf32>
    tpu.vector_store %arg8[%c14_172, %c0_173], %405 {strides = array<i32>} : memref<16x64xf32, #tpu.memory_space<vmem>>, vector<2x32xf32>,
    %407 = vector.extract_strided_slice %404 {offsets = [0, 32], sizes = [2, 32], strides = [1, 1]} : vector<2x64xf32> to vector<2x32xf32>
    %c0_174 = arith.constant 0 : index
    %c32_175 = arith.constant 32 : index
    %408 = vector.load %arg8[%c0_174, %c32_175] : memref<16x64xf32, #tpu.memory_space<vmem>>, vector<2x32xf32>
    tpu.vector_store %arg8[%c0_174, %c32_175], %407 {strides = array<i32>} : memref<16x64xf32, #tpu.memory_space<vmem>>, vector<2x32xf32>,
    return
  }
  func.func @transform_0(%arg0: i32) -> (i32, i32) {
    %c0_i32 = arith.constant 0 : i32
    %c0_i32_0 = arith.constant 0 : i32
    %c0_i32_1 = arith.constant 0 : i32
    return %c0_i32, %c0_i32_0 : i32, i32
  }
  func.func @transform_1(%arg0: i32) -> (i32, i32) {
    %c0_i32 = arith.constant 0 : i32
    %c0_i32_0 = arith.constant 0 : i32
    %c0_i32_1 = arith.constant 0 : i32
    return %c0_i32, %c0_i32_0 : i32, i32
  }
  func.func @transform_2(%arg0: i32) -> (i32, i32) {
    %c0_i32 = arith.constant 0 : i32
    %c0_i32_0 = arith.constant 0 : i32
    %c0_i32_1 = arith.constant 0 : i32
    return %c0_i32, %c0_i32_0 : i32, i32
  }
  func.func @transform_3(%arg0: i32) -> (i32, i32) {
    %c0_i32 = arith.constant 0 : i32
    %c0_i32_0 = arith.constant 0 : i32
    %c0_i32_1 = arith.constant 0 : i32
    return %c0_i32, %c0_i32_0 : i32, i32
  }
  func.func @transform_4(%arg0: i32) -> (i32, i32) {
    %c0_i32 = arith.constant 0 : i32
    %c0_i32_0 = arith.constant 0 : i32
    %c0_i32_1 = arith.constant 0 : i32
    return %c0_i32, %c0_i32_0 : i32, i32
  }
  func.func @transform_5(%arg0: i32) -> (i32, i32) {
    %c0_i32 = arith.constant 0 : i32
    %c0_i32_0 = arith.constant 0 : i32
    %c0_i32_1 = arith.constant 0 : i32
    return %c0_i32, %c0_i32_0 : i32, i32
  }
  func.func @transform_6(%arg0: i32) -> (i32, i32) {
    %c0_i32 = arith.constant 0 : i32
    %c0_i32_0 = arith.constant 0 : i32
    %c0_i32_1 = arith.constant 0 : i32
    return %c0_i32, %c0_i32_0 : i32, i32
  }
  func.func @transform_7(%arg0: i32) -> (i32, i32) {
    %c0_i32 = arith.constant 0 : i32
    %c0_i32_0 = arith.constant 0 : i32
    %c0_i32_1 = arith.constant 0 : i32
    return %c0_i32, %c0_i32_0 : i32, i32
  }
}

</mosaic_0001>

<bundles_post_ra>
// kernel: encoder_forward.1
= control target key start
LH: loop header
LB: loop body
LE: loop exit
PB: predicated region body
PF: predicated region fallthrough
CT: control target
= control target key end

     0   :  { %12 = vsyncpa [#allocation5], 0  ;;  %s3496_s0 = inlined_call_operand.vmem [shape: f32[16,32], index: 0, kind: input, shape index: {}]   ;;  %s3497_s1 = inlined_call_operand.vmem [shape: f32[32,256], index: 1, kind: input, shape index: {}]   ;;  %s3498_s2 = inlined_call_operand.vmem [shape: f32[64,256], index: 2, kind: input, shape index: {}]   ;;  %s3499_s3 = inlined_call_operand.vmem [shape: f32[1,256], index: 3, kind: input, shape index: {}]   ;;  %s3500_s4 = inlined_call_operand.hbm [shape: f32[64,256], index: 4, kind: input, shape index: {}]   ;;  %s3501_s5 = inlined_call_operand.hbm [shape: f32[64,256], index: 5, kind: input, shape index: {}]   ;;  %s3502_s6 = inlined_call_operand.vmem [shape: f32[1,256], index: 6, kind: input, shape index: {}]   ;;  %s3503_s7 = inlined_call_operand.vmem [shape: f32[16,64], index: 7, kind: output, shape index: {}]  }
   0x1   :  { %13 = vsyncpa [#allocation7], 0  ;;  %s2894_s24 = smov [#allocation4]   ;;  %s2846_s28 = scalar_lea.hbm %s3500_s4, 2048 }
   0x2   :  { %s27_s25 = sshll.u32 %s2894_s24, 4  ;;  %p2847_p0 = scmp.ne.s32.totalorder %s3500_s4, %s2846_s28  ;;  %s28_s25 = int_to_ptr.vmem [resolvable:$true] %s27_s25 }
   0x3   :  { %p2850_p1 = scmp.lt.u32.totalorder %s2846_s28, %s3500_s4 }
   0x5   :  { %p2852_p2 = pnand %p2850_p1, %p2847_p0 }
   0x7   :  { %2855 = shalt.err (!%p2852_p2)
}
   0x8   :  { %s2856_s10 = scalar_lea.vmem %s28_s25, 2048  ;;  %p2861_p4 = scmp.lt.s32.totalorder %s28_s25, %s28_s25 }
   0x9   :  { %p2857_p3 = scmp.ne.s32.totalorder %s28_s25, %s2856_s10  ;;  %p2862_p5 = scmp.lt.s32.totalorder %s2856_s10, %s2856_s10 }
   0xb   :  { %p2863_p6 = por %p2862_p5, %p2861_p4 }
   0xd   :  { %p2864_p7 = pnand %p2863_p6, %p2857_p3 }
   0xf   :  { %2867 = shalt.err (!%p2864_p7)
}
  0x10   :  { %s2895_s11 = smov 256   ;;  %s2896_s12 = smov 16  }
  0x11   :  { %33 = dma.hbm_to_vmem [thread:$0]  %s3500_s4, 2048, %s28_s25, [#allocation5], %s2895_s11, %s2895_s11, %s2896_s12  }
  0x12   :  { %s2897_s15 = smov [#allocation6]   ;;  %s2868_s19 = scalar_lea.hbm %s3501_s5, 2048 }
  0x13   :  { %s39_s16 = sshll.u32 %s2897_s15, 4  ;;  %p2869_p8 = scmp.ne.s32.totalorder %s3501_s5, %s2868_s19  ;;  %s40_s16 = int_to_ptr.vmem [resolvable:$true] %s39_s16 }
  0x14   :  { %p2872_p9 = scmp.lt.u32.totalorder %s2868_s19, %s3501_s5 }
  0x16   :  { %p2874_p10 = pnand %p2872_p9, %p2869_p8 }
  0x18   :  { %2877 = shalt.err (!%p2874_p10)
}
  0x19   :  { %s2878_s24 = scalar_lea.vmem %s40_s16, 2048  ;;  %p2883_p12 = scmp.lt.s32.totalorder %s40_s16, %s40_s16 }
  0x1a   :  { %p2879_p11 = scmp.ne.s32.totalorder %s40_s16, %s2878_s24  ;;  %p2884_p13 = scmp.lt.s32.totalorder %s2878_s24, %s2878_s24 }
  0x1c   :  { %p2885_p0 = por %p2884_p13, %p2883_p12 }
  0x1e   :  { %p2886_p1 = pnand %p2885_p0, %p2879_p11 }
  0x20   :  { %2889 = shalt.err (!%p2886_p1)
}
  0x21   :  { %45 = dma.hbm_to_vmem [thread:$0]  %s3501_s5, 2048, %s40_s16, [#allocation7], %s2895_s11, %s2895_s11, %s2896_s12  }
  0x22   :  { %2890 = dma.done.wait [#allocation5], 2048  }
  0x23   :  { %2891 = vsyncadd [#allocation5], 4294965248 }
  0x24   :  { %2892 = dma.done.wait [#allocation7], 2048  }
  0x25   :  { %2893 = vsyncadd [#allocation7], 4294965248  ;;  %v2898_v0 = vmov 0.0   ;;  %v64_v1 = vld [vmem:[%s3497_s1 + $0x8] sm:$0xff]  ;;  %v66_v2 = vld [vmem:[%s3497_s1 + $0x18] sm:$0xff]  ;;  %vm83_vm0 = vcmask 261120   ;;  %v54_v39 = vlaneseq }
  0x26   :  { %154 = vmatprep.mubr.f32.mxu0 %v2898_v0  ;;  %267 = vmatprep.mubr.f32.mxu1 %v2898_v0  ;;  %v63_v3 = vld [vmem:[%s3497_s1] sm:$0xff]  ;;  %v2368_v4 = vpack.c.bf16 %v66_v2, %v64_v1  ;;  %v65_v5 = vld [vmem:[%s3497_s1 + $0x10] sm:$0xff]  ;;  %v68_v6 = vld [vmem:[%s3497_s1 + $0x28] sm:$0xff]  ;;  %vm302_vm3 = vcmask 254976   ;;  %vm304_vm4 = vcmask 517376   ;;  %vm199_vm5 = vcmask 523264  }
  0x27   :  { %v70_v7 = vld [vmem:[%s3497_s1 + $0x38] sm:$0xff]  ;;  %v2370_v8 = vpack.c.bf16 %v65_v5, %v63_v3  ;;  %v67_v10 = vld [vmem:[%s3497_s1 + $0x20] sm:$0xff]  ;;  %v69_v11 = vld [vmem:[%s3497_s1 + $0x30] sm:$0xff]  ;;  %v3092_v40 = vshrl.u32 %v54_v39, 7  ;;  %v55_v54 = vand.u32 127, %v54_v39  ;;  %vm428_vm6 = vcmask 257026  }
  0x28   :  { %v2372_v9 = vpack.c.bf16 %v70_v7, %v68_v6  ;;  %2369 = vmatprep.subr.bf16.mxu0 %v2368_v4  ;;  %v172_v12 = vld [vmem:[%s3498_s2 + $0x8] sm:$0xff]  ;;  %v174_v13 = vld [vmem:[%s3498_s2 + $0x18] sm:$0xff]  ;;  %v171_v14 = vld [vmem:[%s3498_s2] sm:$0xff]  ;;  %v2374_v15 = vpack.c.bf16 %v69_v11, %v67_v10  ;;  %vm430_vm7 = vcmask 519426   ;;  %vm686_vm8 = vcmask 261126  }
  0x29   :  { %2371 = vmatpush1.bf16.msra.mxu0 %v2370_v8  ;;  %v2999_v16 = vpack.c.bf16 %v174_v13, %v172_v12  ;;  %v173_v17 = vld [vmem:[%s3498_s2 + $0x10] sm:$0xff]  ;;  %v176_v18 = vld [vmem:[%s3498_s2 + $0x28] sm:$0xff]  ;;  %v178_v20 = vld [vmem:[%s3498_s2 + $0x38] sm:$0xff]  ;;  %v75_v41 = vsub.s32 0, %v3092_v40  ;;  %v79_v43 = vsub.s32 1, %v3092_v40  ;;  %v57_v56 = vand.u32 63, %v55_v54 }
  0x2a   :  { %2373 = vmatprep.subr.bf16.mxu0 %v2372_v9  ;;  %v3007_v19 = vpack.c.bf16 %v173_v17, %v171_v14  ;;  %v175_v21 = vld [vmem:[%s3498_s2 + $0x20] sm:$0xff]  ;;  %v177_v22 = vld [vmem:[%s3498_s2 + $0x30] sm:$0xff]  ;;  %v3019_v23 = vpack.c.bf16 %v178_v20, %v176_v18  ;;  %v180_v24 = vld [vmem:[%s3498_s2 + $0x48] sm:$0xff]  ;;  %v56_v63 = vadd.s32 128, %v55_v54  ;;  %vm688_vm9 = vcmask 523526  }
  0x2b   :  { %2377 = vmatprep.subr.bf16.mxu1 %v2999_v16  ;;  %v182_v25 = vld [vmem:[%s3498_s2 + $0x58] sm:$0xff]  ;;  %v3028_v26 = vpack.c.bf16 %v177_v22, %v175_v21  ;;  %v61_v27 = vld [vmem:[%s3496_s0] sm:$0xff]  ;;  %v181_v30 = vld [vmem:[%s3498_s2 + $0x50] sm:$0xff]  ;;  %vm3103_vm1 = vcmp.lt.s32.totalorder %v57_v56, 32  ;;  %vm557_vm10 = vcmask 259076   ;;  %vm559_vm11 = vcmask 521476  }
  0x2c   :  { %2379 = vmatpush1.bf16.msra.mxu1 %v3007_v19  ;;  %v3034_v28 = vpack.c.bf16 %v182_v25, %v180_v24  ;;  %v179_v29 = vld [vmem:[%s3498_s2 + $0x40] sm:$0xff]  ;;  %v184_v31 = vld [vmem:[%s3498_s2 + $0x68] sm:$0xff]  ;;  %v186_v32 = vld [vmem:[%s3498_s2 + $0x78] sm:$0xff]  ;;  %v58_v4 = vand.u32 63, %v56_v63 }
  0x2d   :  { %2375 = vmatpush1.bf16.msra.mxu0 %v2374_v15  ;;  %2381 = vmatprep.subr.bf16.mxu1 %v3019_v23  ;;  %v3051_v33 = vpack.c.bf16 %v181_v30, %v179_v29  ;;  %v62_v34 = vld [vmem:[%s3496_s0 + $0x8] sm:$0xff]  ;;  %v3058_v35 = vpack.c.bf16 %v186_v32, %v184_v31  ;;  %v183_v36 = vld [vmem:[%s3498_s2 + $0x60] sm:$0xff]  ;;  %v185_v37 = vld [vmem:[%s3498_s2 + $0x70] sm:$0xff] }
  0x2e   :  { %2393 = vmatprep.subr.bf16.mxu0 %v2999_v16  ;;  %v3070_v38 = vpack.c.bf16 %v185_v37, %v183_v36  ;;  %v71_v42 = vld [vmem:[%s3499_s3] sm:$0x3]  ;;  %vm3109_vm2 = vcmp.lt.s32.totalorder %v58_v4, 32  ;;  %s2899_s3 = smov 64  }
  0x2f   :  { %v76_v44 = vrot.slane %v71_v42, %v75_v41  ;;  %v80_v45 = vrot.slane %v71_v42, %v79_v43 }
  0x30   :  { %2318 = vmatmul.mubr.msk.f32.vlgmr.msra.gmra.mrb[0].mxu0 %vm83_vm0, %v61_v27  ;;  %2383 = vmatpush1.bf16.msra.mxu1 %v3028_v26 }
  0x31   :  { %160 = vmatprep.mubr.f32.mxu0 %v2898_v0  ;;  %2385 = vmatprep.subr.bf16.mxu1 %v3034_v28 }
  0x32   :  { %2395 = vmatpush1.bf16.msra.mxu0 %v3007_v19 }
  0x33   :  { %2397 = vmatprep.subr.bf16.mxu0 %v3019_v23 }
  0x34   :  { %2319 = vmatmul.mubr.msk.f32.gmra.mrb[2].mxu0 %vm83_vm0, %v62_v34  ;;  %2387 = vmatpush1.bf16.msra.mxu1 %v3051_v33 }
  0x35   :  { %2389 = vmatprep.subr.bf16.mxu1 %v3058_v35  ;;  %384 = vmatprep.mubr.f32.mxu0 %v2898_v0 }
  0x36   :  { %2399 = vmatpush1.bf16.msra.mxu0 %v3028_v26 }
  0x37   :  { %2401 = vmatprep.subr.bf16.mxu0 %v3034_v28 }
  0x38   :  { %2391 = vmatpush1.bf16.msra.mxu1 %v3070_v38 }
  0x39   :  { %2409 = vmatprep.subr.bf16.mxu1 %v2999_v16 }
  0x3a   :  { %2403 = vmatpush1.bf16.msra.mxu0 %v3051_v33 }
  0x3b   :  { %268 = vmatmul.mubr.f32.vlgmr.msra.gmra.mrb[0].mxu1 %v2898_v0  ;;  %2405 = vmatprep.subr.bf16.mxu0 %v3058_v35 }
  0x3c   :  { %2411 = vmatpush1.bf16.msra.mxu1 %v3007_v19  ;;  %513 = vmatprep.mubr.f32.mxu1 %v2898_v0 }
  0x3d   :  { %2413 = vmatprep.subr.bf16.mxu1 %v3019_v23 }
  0x3e   :  { %2407 = vmatpush1.bf16.msra.mxu0 %v3070_v38 }
  0x3f   :  { %2425 = vmatprep.subr.bf16.mxu0 %v2999_v16 }
  0x40   :  { %2415 = vmatpush1.bf16.msra.mxu1 %v3028_v26 }
  0x41   :  { %2417 = vmatprep.subr.bf16.mxu1 %v3034_v28 }
  0x44   :  { %2419 = vmatpush1.bf16.msra.mxu1 %v3051_v33 }
  0x45   :  { %2421 = vmatprep.subr.bf16.mxu1 %v3058_v35 }
  0x48   :  { %2423 = vmatpush1.bf16.msra.mxu1 %v3070_v38 }
  0x49   :  { %2441 = vmatprep.subr.bf16.mxu1 %v2999_v16 }
 0x103   :  { %v156_v46 = vpop.f32.mrb[0].mxu0 }
 0x104   :  { %v157_v47 = vadd.f32 %v156_v46, %v76_v44  ;;  %v158_v48 = vpop.f32.mrb[1].mxu0 }
 0x105   :  { %v159_v49 = vadd.f32 %v158_v48, %v80_v45 }
 0x106   :  { %167 = vst [vmem:[#allocation3] sm:$0xff] %v157_v47 }
 0x107   :  { %168 = vst [vmem:[#allocation3 + $0x8] sm:$0xff] %v159_v49  ;;  %v162_v50 = vpop.f32.mrb[2].mxu0 }
 0x108   :  { %v163_v51 = vadd.f32 %v162_v50, %v76_v44  ;;  %v164_v52 = vpop.f32.mrb[3].mxu0 }
 0x109   :  { %v165_v53 = vadd.f32 %v164_v52, %v80_v45 }
 0x10a   :  { %169 = vst [vmem:[#allocation3 + $0x10] sm:$0xff] %v163_v51 }
 0x10b   :  { %170 = vst [vmem:[#allocation3 + $0x18] sm:$0xff] %v165_v53 }
 0x10d   :  { %v187_v61 = vld [vmem:[#allocation3] sm:$0x3]  ;;  %v306_v34 = vld [vmem:[#allocation3] sm:$0xc] }
 0x10e   :  { %v269_v55 = vpop.f32.mrb[0].mxu1  ;;  %v188_v7 = vld [vmem:[#allocation3 + $0x8] sm:$0x3]  ;;  %v307_v48 = vld [vmem:[#allocation3 + $0x8] sm:$0xc] }
 0x10f   :  { %v271_v57 = vpop.f32.mrb[1].mxu1 }
 0x111   :  { %v189_v58 = vld [vmem:[#allocation3 + $0x10] sm:$0xc0]  ;;  %v308_v30 = vld [vmem:[#allocation3 + $0x10] sm:$0x30] }
 0x112   :  { %v193_v59 = vrot.slane %v189_v58, 6  ;;  %v190_v3 = vld [vmem:[#allocation3 + $0x18] sm:$0xc0]  ;;  %v312_v31 = vrot.slane %v308_v30, 2  ;;  %v309_v45 = vld [vmem:[#allocation3 + $0x18] sm:$0x30] }
 0x113   :  { %v194_v5 = vrot.slane %v190_v3, 6  ;;  %v313_v46 = vrot.slane %v309_v45, 2 }
 0x114   :  { %v197_v62 = vsel %vm3103_vm1, %v187_v61, %v193_v59  ;;  %v316_v39 = vsel %vm3103_vm1, %v306_v34, %v312_v31 }
 0x115   :  { %v274_v1 = vadd.f32 %v269_v55, %v197_v62  ;;  %v198_v8 = vsel %vm3109_vm2, %v188_v7, %v194_v5  ;;  %v317_v49 = vsel %vm3109_vm2, %v307_v48, %v313_v46  ;;  %v434_v7 = vld [vmem:[#allocation3 + $0x10] sm:$0xc] }
 0x116   :  { %v275_v9 = vadd.f32 %v271_v57, %v198_v8  ;;  %v438_v8 = vrot.slane %v434_v7, 6 }
 0x117   :  { %v2320_v2 = vmul.f32 -1.442695, %v274_v1 }
 0x118   :  { %v2321_v15 = vmul.f32 -1.442695, %v275_v9 }
 0x119   :  { %2654 = vpow2.f32 %v2320_v2 }
 0x11a   :  { %2656 = vtanh.f32 %v275_v9 }
 0x123   :  { %v2655_v10 = vpop.eup %2654 }
 0x124   :  { %v282_v11 = vadd.f32 1.0, %v2655_v10  ;;  %v2657_v12 = vpop.eup %2656  ;;  %v432_v10 = vld [vmem:[#allocation3] sm:$0x30] }
 0x126   :  { %2658 = vrcp.f32 %v282_v11 }
 0x127   :  { %2660 = vpow2.f32 %v2321_v15 }
 0x130   :  { %v2659_v13 = vpop.eup %2658 }
 0x131   :  { %v290_v14 = vmul.f32 %v2659_v13, %v2657_v12  ;;  %v2661_v17 = vpop.eup %2660  ;;  %v289_v20 = vmul.f32 0.0, %v2659_v13  ;;  %v442_v13 = vsel %vm3103_vm1, %v432_v10, %v438_v8 }
 0x132   :  { %v283_v18 = vadd.f32 1.0, %v2661_v17  ;;  %v435_v17 = vld [vmem:[#allocation3 + $0x18] sm:$0xc] }
 0x133   :  { %292 = vrot.lane.b32.xlu0 %v290_v14, %s2899_s3 }
 0x134   :  { %2662 = vrcp.f32 %v283_v18  ;;  %v439_v18 = vrot.slane %v435_v17, 6 }
 0x13e   :  { %v2663_v24 = vpop.eup %2662 }
 0x1a5   :  { %v293_v21 = vpop.permute.xlu0 %292 }
 0x1a6   :  { %v295_v22 = vadd.f32 %v293_v21, %v289_v20  ;;  %v433_v21 = vld [vmem:[#allocation3 + $0x8] sm:$0x30] }
 0x1a8   :  { %2664 = vtanh.f32 %v295_v22  ;;  %v413_v54 = vrot.slane %v295_v22, 6  ;;  %v443_v22 = vsel %vm3109_vm2, %v433_v21, %v439_v18 }
 0x1b2   :  { %v2665_v25 = vpop.eup %2664 }
 0x1b3   :  { %v297_v27 = vmul.f32 %v2665_v25, %v2663_v24 }
 0x1b5   :  { %299 = vrot.lane.b32.xlu0 %v297_v27, %s2899_s3 }
 0x227   :  { %v300_v29 = vpop.permute.xlu0 %299 }
 0x228   :  { %303 = vst.msk [vmem:[#allocation2] sm:$0x3] %vm302_vm3, %v300_v29  ;;  %2322 = vmatmul.mubr.msk.f32.vlgmr.msra.gmra.mrb[4].mxu0 %vm199_vm5, %v300_v29 }
 0x229   :  { %305 = vst.msk [vmem:[#allocation2 + $0xe] sm:$0x3] %vm304_vm4, %v300_v29  ;;  %2427 = vmatpush1.bf16.msra.mxu0 %v3007_v19  ;;  %642 = vmatprep.mubr.f32.mxu0 %v2898_v0 }
 0x22a   :  { %2429 = vmatprep.subr.bf16.mxu0 %v3019_v23 }
 0x22d   :  { %2431 = vmatpush1.bf16.msra.mxu0 %v3028_v26 }
 0x22e   :  { %2433 = vmatprep.subr.bf16.mxu0 %v3034_v28 }
 0x231   :  { %2435 = vmatpush1.bf16.msra.mxu0 %v3051_v33 }
 0x232   :  { %2437 = vmatprep.subr.bf16.mxu0 %v3058_v35 }
 0x235   :  { %2439 = vmatpush1.bf16.msra.mxu0 %v3070_v38 }
 0x236   :  { %2457 = vmatprep.subr.bf16.mxu0 %v2999_v16 }
 0x2fb   :  { %v386_v32 = vpop.f32.mrb[4].mxu0 }
 0x2fc   :  { %v393_v36 = vrot.slane %v386_v32, 6  ;;  %v388_v37 = vpop.f32.mrb[5].mxu0 }
 0x2fd   :  { %v394_v47 = vrot.slane %v388_v37, 6 }
 0x2fe   :  { %v397_v42 = vadd.f32 %v393_v36, %v316_v39 }
 0x2ff   :  { %v398_v50 = vadd.f32 %v394_v47, %v317_v49 }
 0x300   :  { %v2323_v44 = vmul.f32 -1.442695, %v397_v42 }
 0x301   :  { %v2324_v58 = vmul.f32 -1.442695, %v398_v50 }
 0x302   :  { %2666 = vpow2.f32 %v2323_v44 }
 0x303   :  { %2668 = vtanh.f32 %v398_v50  ;;  %v563_v50 = vld [vmem:[#allocation3 + $0x10] sm:$0x3] }
 0x30c   :  { %v2667_v51 = vpop.eup %2666 }
 0x30d   :  { %v405_v52 = vadd.f32 1.0, %v2667_v51  ;;  %v2669_v53 = vpop.eup %2668  ;;  %v567_v51 = vrot.slane %v563_v50, 2 }
 0x30f   :  { %2670 = vrcp.f32 %v405_v52 }
 0x310   :  { %2672 = vpow2.f32 %v2324_v58 }
 0x319   :  { %v2671_v55 = vpop.eup %2670 }
 0x31a   :  { %v416_v56 = vmul.f32 %v2671_v55, %v2669_v53  ;;  %v415_v57 = vmul.f32 %v2671_v55, %v413_v54  ;;  %v2673_v59 = vpop.eup %2672  ;;  %v561_v53 = vld [vmem:[#allocation3] sm:$0xc0] }
 0x31b   :  { %v406_v61 = vadd.f32 1.0, %v2673_v59  ;;  %v564_v59 = vld [vmem:[#allocation3 + $0x18] sm:$0x3] }
 0x31c   :  { %418 = vrot.lane.b32.xlu1 %v416_v56, %s2899_s3  ;;  %v571_v56 = vsel %vm3103_vm1, %v561_v53, %v567_v51 }
 0x31d   :  { %2674 = vrcp.f32 %v406_v61  ;;  %v568_v61 = vrot.slane %v564_v59, 2 }
 0x327   :  { %v2675_v1 = vpop.eup %2674 }
 0x38e   :  { %v419_v62 = vpop.permute.xlu1 %418 }
 0x38f   :  { %v421_v63 = vadd.f32 %v419_v62, %v415_v57 }
 0x391   :  { %2676 = vtanh.f32 %v421_v63  ;;  %v542_v30 = vrot.slane %v421_v63, 6  ;;  %v562_v63 = vld [vmem:[#allocation3 + $0x8] sm:$0xc0] }
 0x39b   :  { %v2677_v2 = vpop.eup %2676 }
 0x39c   :  { %v3134_v3 = vmul.f32 %v2677_v2, %v2675_v1  ;;  %v572_v1 = vsel %vm3109_vm2, %v562_v63, %v568_v61  ;;  %v813_v63 = vld [vmem:[#allocation3] sm:$0x30] }
 0x39e   :  { %v444_v4 = vrot.slane %v3134_v3, 2 }
 0x3a0   :  { %445 = vrot.lane.b32.xlu1 %v444_v4, %s2899_s3 }
 0x412   :  { %v446_v5 = vpop.permute.xlu1 %445 }
 0x413   :  { %2325 = vmatmul.mubr.msk.f32.vlgmr.msra.gmra.mrb[2].mxu1 %vm199_vm5, %v446_v5 }
 0x414   :  { %2443 = vmatpush1.bf16.msra.mxu1 %v3007_v19  ;;  %771 = vmatprep.mubr.f32.mxu1 %v2898_v0 }
 0x415   :  { %2445 = vmatprep.subr.bf16.mxu1 %v3019_v23 }
 0x418   :  { %2447 = vmatpush1.bf16.msra.mxu1 %v3028_v26 }
 0x419   :  { %2449 = vmatprep.subr.bf16.mxu1 %v3034_v28 }
 0x41c   :  { %2451 = vmatpush1.bf16.msra.mxu1 %v3051_v33 }
 0x41d   :  { %2453 = vmatprep.subr.bf16.mxu1 %v3058_v35 }
 0x420   :  { %2455 = vmatpush1.bf16.msra.mxu1 %v3070_v38 }
 0x421   :  { %2473 = vmatprep.subr.bf16.mxu1 %v2999_v16 }
 0x4e6   :  { %v515_v9 = vpop.f32.mrb[2].mxu1 }
 0x4e7   :  { %v522_v11 = vrot.slane %v515_v9, 4  ;;  %v517_v12 = vpop.f32.mrb[3].mxu1 }
 0x4e8   :  { %v523_v20 = vrot.slane %v517_v12, 4 }
 0x4e9   :  { %v526_v14 = vadd.f32 %v522_v11, %v442_v13 }
 0x4ea   :  { %v527_v24 = vadd.f32 %v523_v20, %v443_v22 }
 0x4eb   :  { %v2326_v15 = vmul.f32 -1.442695, %v526_v14 }
 0x4ec   :  { %v2327_v36 = vmul.f32 -1.442695, %v527_v24 }
 0x4ed   :  { %2678 = vpow2.f32 %v2326_v15 }
 0x4ee   :  { %2680 = vtanh.f32 %v527_v24  ;;  %v692_v24 = vld [vmem:[#allocation3] sm:$0xc0] }
 0x4f7   :  { %v2679_v25 = vpop.eup %2678 }
 0x4f8   :  { %v534_v27 = vadd.f32 1.0, %v2679_v25  ;;  %v2681_v29 = vpop.eup %2680  ;;  %v690_v25 = vld [vmem:[#allocation3 + $0x10] sm:$0x3] }
 0x4fa   :  { %2682 = vrcp.f32 %v534_v27  ;;  %v696_v27 = vrot.slane %v692_v24, 6 }
 0x4fb   :  { %2684 = vpow2.f32 %v2327_v36  ;;  %v693_v36 = vld [vmem:[#allocation3 + $0x8] sm:$0xc0] }
 0x504   :  { %v2683_v31 = vpop.eup %2682 }
 0x505   :  { %v545_v32 = vmul.f32 %v2683_v31, %v2681_v29  ;;  %v544_v34 = vmul.f32 %v2683_v31, %v542_v30  ;;  %v2685_v37 = vpop.eup %2684  ;;  %v700_v29 = vsel %vm3103_vm1, %v690_v25, %v696_v27 }
 0x506   :  { %v535_v39 = vadd.f32 1.0, %v2685_v37  ;;  %v691_v37 = vld [vmem:[#allocation3 + $0x18] sm:$0x3] }
 0x507   :  { %547 = vrot.lane.b32.xlu0 %v545_v32, %s2899_s3 }
 0x508   :  { %2686 = vrcp.f32 %v535_v39  ;;  %v697_v39 = vrot.slane %v693_v36, 6 }
 0x512   :  { %v2687_v45 = vpop.eup %2686 }
 0x579   :  { %v548_v42 = vpop.permute.xlu0 %547 }
 0x57a   :  { %v550_v44 = vadd.f32 %v548_v42, %v544_v34  ;;  %v701_v42 = vsel %vm3109_vm2, %v691_v37, %v697_v39 }
 0x57c   :  { %2688 = vtanh.f32 %v550_v44  ;;  %v671_v7 = vrot.slane %v550_v44, 6 }
 0x586   :  { %v2689_v46 = vpop.eup %2688 }
 0x587   :  { %v3153_v47 = vmul.f32 %v2689_v46, %v2687_v45 }
 0x589   :  { %v573_v48 = vrot.slane %v3153_v47, 4 }
 0x58b   :  { %574 = vrot.lane.b32.xlu1 %v573_v48, %s2899_s3 }
 0x5fd   :  { %v575_v49 = vpop.permute.xlu1 %574 }
 0x5fe   :  { %2328 = vmatmul.mubr.msk.f32.vlgmr.msra.gmra.mrb[6].mxu0 %vm199_vm5, %v575_v49 }
 0x5ff   :  { %2459 = vmatpush1.bf16.msra.mxu0 %v3007_v19  ;;  %889 = vmatprep.mubr.f32.mxu0 %v2898_v0 }
 0x600   :  { %2461 = vmatprep.subr.bf16.mxu0 %v3019_v23 }
 0x603   :  { %2463 = vmatpush1.bf16.msra.mxu0 %v3028_v26 }
 0x604   :  { %2465 = vmatprep.subr.bf16.mxu0 %v3034_v28 }
 0x607   :  { %2467 = vmatpush1.bf16.msra.mxu0 %v3051_v33 }
 0x608   :  { %2469 = vmatprep.subr.bf16.mxu0 %v3058_v35 }
 0x60b   :  { %2471 = vmatpush1.bf16.msra.mxu0 %v3070_v38 }
 0x60c   :  { %2489 = vmatprep.subr.bf16.mxu0 %v2999_v16 }
 0x6d1   :  { %v644_v52 = vpop.f32.mrb[6].mxu0 }
 0x6d2   :  { %v651_v54 = vrot.slane %v644_v52, 2  ;;  %v646_v55 = vpop.f32.mrb[7].mxu0 }
 0x6d3   :  { %v652_v62 = vrot.slane %v646_v55, 2 }
 0x6d4   :  { %v655_v57 = vadd.f32 %v651_v54, %v571_v56 }
 0x6d5   :  { %v656_v16 = vadd.f32 %v652_v62, %v572_v1  ;;  %v811_v1 = vld [vmem:[#allocation3 + $0x10] sm:$0xc] }
 0x6d6   :  { %v2329_v58 = vmul.f32 -1.442695, %v655_v57 }
 0x6d7   :  { %v2330_v11 = vmul.f32 -1.442695, %v656_v16 }
 0x6d8   :  { %2690 = vpow2.f32 %v2329_v58 }
 0x6d9   :  { %2692 = vtanh.f32 %v656_v16  ;;  %v817_v16 = vrot.slane %v813_v63, 2 }
 0x6e2   :  { %v2691_v2 = vpop.eup %2690 }
 0x6e3   :  { %v663_v4 = vadd.f32 1.0, %v2691_v2  ;;  %v2693_v5 = vpop.eup %2692 }
 0x6e5   :  { %2694 = vrcp.f32 %v663_v4 }
 0x6e6   :  { %2696 = vpow2.f32 %v2330_v11 }
 0x6ef   :  { %v2695_v8 = vpop.eup %2694 }
 0x6f0   :  { %v674_v9 = vmul.f32 %v2695_v8, %v2693_v5  ;;  %v673_v10 = vmul.f32 %v2695_v8, %v671_v7  ;;  %v2697_v12 = vpop.eup %2696  ;;  %v821_v5 = vsel %vm3103_vm1, %v811_v1, %v817_v16 }
 0x6f1   :  { %v664_v13 = vadd.f32 1.0, %v2697_v12 }
 0x6f2   :  { %676 = vrot.lane.b32.xlu0 %v674_v9, %s2899_s3 }
 0x6f3   :  { %2698 = vrcp.f32 %v664_v13 }
 0x6fd   :  { %v2699_v17 = vpop.eup %2698 }
 0x764   :  { %v677_v14 = vpop.permute.xlu0 %676 }
 0x765   :  { %v679_v15 = vadd.f32 %v677_v14, %v673_v10 }
 0x767   :  { %2700 = vtanh.f32 %v679_v15  ;;  %v794_v49 = vrot.slane %v679_v15, 6 }
 0x771   :  { %v2701_v18 = vpop.eup %2700 }
 0x772   :  { %v3172_v20 = vmul.f32 %v2701_v18, %v2699_v17 }
 0x774   :  { %v702_v21 = vrot.slane %v3172_v20, 6 }
 0x776   :  { %703 = vrot.lane.b32.xlu1 %v702_v21, %s2899_s3 }
 0x7e8   :  { %v704_v22 = vpop.permute.xlu1 %703 }
 0x7e9   :  { %2331 = vmatmul.mubr.msk.f32.vlgmr.msra.gmra.mrb[4].mxu1 %vm199_vm5, %v704_v22 }
 0x7ea   :  { %2475 = vmatpush1.bf16.msra.mxu1 %v3007_v19  ;;  %1016 = vmatprep.mubr.f32.mxu1 %v2898_v0 }
 0x7eb   :  { %2477 = vmatprep.subr.bf16.mxu1 %v3019_v23 }
 0x7ee   :  { %2479 = vmatpush1.bf16.msra.mxu1 %v3028_v26 }
 0x7ef   :  { %2481 = vmatprep.subr.bf16.mxu1 %v3034_v28 }
 0x7f2   :  { %2483 = vmatpush1.bf16.msra.mxu1 %v3051_v33 }
 0x7f3   :  { %2485 = vmatprep.subr.bf16.mxu1 %v3058_v35 }
 0x7f6   :  { %2487 = vmatpush1.bf16.msra.mxu1 %v3070_v38 }
 0x8bc   :  { %v773_v30 = vpop.f32.mrb[4].mxu1 }
 0x8bd   :  { %v778_v31 = vadd.f32 %v773_v30, %v700_v29  ;;  %v775_v32 = vpop.f32.mrb[5].mxu1 }
 0x8be   :  { %v779_v44 = vadd.f32 %v775_v32, %v701_v42  ;;  %v937_v32 = vld [vmem:[#allocation3] sm:$0xc] }
 0x8bf   :  { %v2332_v34 = vmul.f32 -1.442695, %v778_v31  ;;  %v941_v36 = vrot.slane %v937_v32, 6 }
 0x8c0   :  { %v2333_v53 = vmul.f32 -1.442695, %v779_v44 }
 0x8c1   :  { %2702 = vpow2.f32 %v2332_v34  ;;  %v935_v34 = vld [vmem:[#allocation3 + $0x10] sm:$0x30] }
 0x8c2   :  { %2704 = vtanh.f32 %v779_v44  ;;  %v945_v44 = vsel %vm3103_vm1, %v935_v34, %v941_v36  ;;  %v1192_v34 = vld [vmem:[#allocation4 + $0x8] sm:$0xff]  ;;  %v1194_v36 = vld [vmem:[#allocation4 + $0x18] sm:$0xff] }
 0x8cb   :  { %v2703_v45 = vpop.eup %2702 }
 0x8cc   :  { %v786_v46 = vadd.f32 1.0, %v2703_v45  ;;  %v2705_v48 = vpop.eup %2704 }
 0x8ce   :  { %2706 = vrcp.f32 %v786_v46 }
 0x8cf   :  { %2708 = vpow2.f32 %v2333_v53 }
 0x8d8   :  { %v2707_v50 = vpop.eup %2706 }
 0x8d9   :  { %v797_v51 = vmul.f32 %v2707_v50, %v2705_v48  ;;  %v796_v52 = vmul.f32 %v2707_v50, %v794_v49  ;;  %v2709_v54 = vpop.eup %2708  ;;  %v938_v48 = vld [vmem:[#allocation3 + $0x8] sm:$0xc]  ;;  %v936_v49 = vld [vmem:[#allocation3 + $0x18] sm:$0x30] }
 0x8da   :  { %v787_v55 = vadd.f32 1.0, %v2709_v54 }
 0x8db   :  { %799 = vrot.lane.b32.xlu0 %v797_v51, %s2899_s3  ;;  %v942_v51 = vrot.slane %v938_v48, 6 }
 0x8dc   :  { %2710 = vrcp.f32 %v787_v55 }
 0x8e6   :  { %v2711_v58 = vpop.eup %2710 }
 0x94d   :  { %v800_v56 = vpop.permute.xlu0 %799 }
 0x94e   :  { %v802_v57 = vadd.f32 %v800_v56, %v796_v52  ;;  %v946_v52 = vsel %vm3109_vm2, %v936_v49, %v942_v51  ;;  %v1195_v49 = vld [vmem:[#allocation4 + $0x20] sm:$0xff] }
 0x950   :  { %2712 = vtanh.f32 %v802_v57  ;;  %v918_v12 = vrot.slane %v802_v57, 6 }
 0x95a   :  { %v2713_v59 = vpop.eup %2712 }
 0x95b   :  { %v804_v61 = vmul.f32 %v2713_v59, %v2711_v58 }
 0x95d   :  { %806 = vrot.lane.b32.xlu1 %v804_v61, %s2899_s3 }
 0x9cf   :  { %v3191_v62 = vpop.permute.xlu1 %806 }
 0x9d0   :  { %2334 = vmatmul.mubr.msk.f32.vlgmr.msra.gmra.mrb[8].mxu0 %vm199_vm5, %v3191_v62 }
 0x9d1   :  { %2491 = vmatpush1.bf16.msra.mxu0 %v3007_v19  ;;  %1143 = vmatprep.mubr.f32.mxu0 %v2898_v0 }
 0x9d2   :  { %2493 = vmatprep.subr.bf16.mxu0 %v3019_v23 }
 0x9d5   :  { %2495 = vmatpush1.bf16.msra.mxu0 %v3028_v26  ;;  %v814_v26 = vld [vmem:[#allocation3 + $0x8] sm:$0x30] }
 0x9d6   :  { %2497 = vmatprep.subr.bf16.mxu0 %v3034_v28  ;;  %v812_v28 = vld [vmem:[#allocation3 + $0x18] sm:$0xc] }
 0x9d9   :  { %2499 = vmatpush1.bf16.msra.mxu0 %v3051_v33  ;;  %v818_v33 = vrot.slane %v814_v26, 2 }
 0x9da   :  { %2501 = vmatprep.subr.bf16.mxu0 %v3058_v35 }
 0x9db   :  { %v822_v35 = vsel %vm3109_vm2, %v812_v28, %v818_v33  ;;  %v1062_v33 = vld [vmem:[#allocation3 + $0x10] sm:$0xc0] }
 0x9dd   :  { %2503 = vmatpush1.bf16.msra.mxu0 %v3070_v38 }
 0xaa3   :  { %v891_v2 = vpop.f32.mrb[8].mxu0 }
 0xaa4   :  { %v898_v4 = vrot.slane %v891_v2, 6  ;;  %v893_v19 = vpop.f32.mrb[9].mxu0 }
 0xaa5   :  { %v899_v8 = vrot.slane %v893_v19, 6 }
 0xaa6   :  { %v902_v23 = vadd.f32 %v898_v4, %v821_v5 }
 0xaa7   :  { %v903_v38 = vadd.f32 %v899_v8, %v822_v35  ;;  %v1064_v8 = vld [vmem:[#allocation3] sm:$0x3] }
 0xaa8   :  { %v2335_v7 = vmul.f32 -1.442695, %v902_v23  ;;  %v1068_v35 = vrot.slane %v1064_v8, 2  ;;  %v1308_v8 = vld [vmem:[#allocation6 + $0x10] sm:$0xff] }
 0xaa9   :  { %v2336_v17 = vmul.f32 -1.442695, %v903_v38 }
 0xaaa   :  { %2714 = vpow2.f32 %v2335_v7 }
 0xaab   :  { %2716 = vtanh.f32 %v903_v38 }
 0xab4   :  { %v2715_v9 = vpop.eup %2714 }
 0xab5   :  { %v910_v10 = vadd.f32 1.0, %v2715_v9  ;;  %v2717_v11 = vpop.eup %2716 }
 0xab7   :  { %2718 = vrcp.f32 %v910_v10 }
 0xab8   :  { %2720 = vpow2.f32 %v2336_v17 }
 0xac1   :  { %v2719_v13 = vpop.eup %2718 }
 0xac2   :  { %v921_v14 = vmul.f32 %v2719_v13, %v2717_v11  ;;  %v920_v15 = vmul.f32 %v2719_v13, %v918_v12  ;;  %v2721_v18 = vpop.eup %2720  ;;  %v1072_v11 = vsel %vm3103_vm1, %v1062_v33, %v1068_v35 }
 0xac3   :  { %v911_v21 = vadd.f32 1.0, %v2721_v18 }
 0xac4   :  { %923 = vrot.lane.b32.xlu0 %v921_v14, %s2899_s3  ;;  %v1063_v14 = vld [vmem:[#allocation3 + $0x18] sm:$0xc0] }
 0xac5   :  { %2722 = vrcp.f32 %v911_v21 }
 0xacf   :  { %v2723_v25 = vpop.eup %2722 }
 0xb36   :  { %v924_v22 = vpop.permute.xlu0 %923 }
 0xb37   :  { %v926_v24 = vadd.f32 %v924_v22, %v920_v15 }
 0xb39   :  { %2724 = vtanh.f32 %v926_v24  ;;  %v1045_v57 = vrot.slane %v926_v24, 6 }
 0xb43   :  { %v2725_v27 = vpop.eup %2724 }
 0xb44   :  { %v3208_v29 = vmul.f32 %v2725_v27, %v2723_v25 }
 0xb46   :  { %v947_v30 = vrot.slane %v3208_v29, 2 }
 0xb48   :  { %948 = vrot.lane.b32.xlu1 %v947_v30, %s2899_s3 }
 0xbba   :  { %v949_v31 = vpop.permute.xlu1 %948 }
 0xbbb   :  { %2337 = vmatmul.mubr.msk.f32.vlgmr.msra.gmra.mrb[6].mxu1 %vm199_vm5, %v949_v31 }
 0xbbc   :  { %1289 = vmatprep.mubr.f32.mxu1 %v2898_v0 }
 0xc8e   :  { %v1018_v37 = vpop.f32.mrb[6].mxu1 }
 0xc8f   :  { %v1025_v39 = vrot.slane %v1018_v37, 4  ;;  %v1020_v42 = vpop.f32.mrb[7].mxu1  ;;  %v1191_v37 = vld [vmem:[#allocation4] sm:$0xff] }
 0xc90   :  { %v1026_v50 = vrot.slane %v1020_v42, 4  ;;  %v1193_v42 = vld [vmem:[#allocation4 + $0x10] sm:$0xff] }
 0xc91   :  { %v1029_v45 = vadd.f32 %v1025_v39, %v945_v44  ;;  %v2504_v39 = vpack.c.bf16 %v1194_v36, %v1192_v34  ;;  %v1196_v44 = vld [vmem:[#allocation4 + $0x28] sm:$0xff] }
 0xc92   :  { %v1030_v53 = vadd.f32 %v1026_v50, %v946_v52  ;;  %v1197_v50 = vld [vmem:[#allocation4 + $0x30] sm:$0xff] }
 0xc93   :  { %v2338_v46 = vmul.f32 -1.442695, %v1029_v45  ;;  %v1198_v45 = vld [vmem:[#allocation4 + $0x38] sm:$0xff]  ;;  %2505 = vmatprep.subr.bf16.mxu1 %v2504_v39  ;;  %v2510_v51 = vpack.c.bf16 %v1197_v50, %v1195_v49 }
 0xc94   :  { %v2339_v63 = vmul.f32 -1.442695, %v1030_v53  ;;  %v2508_v48 = vpack.c.bf16 %v1198_v45, %v1196_v44  ;;  %v1207_v44 = vld [vmem:[%s3502_s6] sm:$0x3] }
 0xc95   :  { %2726 = vpow2.f32 %v2338_v46  ;;  %v2506_v46 = vpack.c.bf16 %v1193_v42, %v1191_v37  ;;  %v1212_v45 = vrot.slane %v1207_v44, %v75_v41 }
 0xc96   :  { %2728 = vtanh.f32 %v1030_v53 }
 0xc97   :  { %2507 = vmatpush1.bf16.msra.mxu1 %v2506_v46  ;;  %v1216_v46 = vrot.slane %v1207_v44, %v79_v43 }
 0xc98   :  { %2509 = vmatprep.subr.bf16.mxu1 %v2508_v48 }
 0xc9b   :  { %2511 = vmatpush1.bf16.msra.mxu1 %v2510_v51 }
 0xc9f   :  { %v2727_v54 = vpop.eup %2726 }
 0xca0   :  { %v1037_v55 = vadd.f32 1.0, %v2727_v54  ;;  %v2729_v56 = vpop.eup %2728 }
 0xca2   :  { %2730 = vrcp.f32 %v1037_v55 }
 0xca3   :  { %2732 = vpow2.f32 %v2339_v63  ;;  %v1201_v63 = vld [vmem:[#allocation4 + $0x50] sm:$0xff] }
 0xcac   :  { %v2731_v58 = vpop.eup %2730 }
 0xcad   :  { %v1048_v59 = vmul.f32 %v2731_v58, %v2729_v56  ;;  %v1047_v61 = vmul.f32 %v2731_v58, %v1045_v57  ;;  %v2733_v1 = vpop.eup %2732  ;;  %v1202_v57 = vld [vmem:[#allocation4 + $0x58] sm:$0xff]  ;;  %v1199_v58 = vld [vmem:[#allocation4 + $0x40] sm:$0xff] }
 0xcae   :  { %v1038_v16 = vadd.f32 1.0, %v2733_v1  ;;  %v1204_v1 = vld [vmem:[#allocation4 + $0x68] sm:$0xff] }
 0xcaf   :  { %1050 = vrot.lane.b32.xlu0 %v1048_v59, %s2899_s3 }
 0xcb0   :  { %2734 = vrcp.f32 %v1038_v16  ;;  %v1206_v16 = vld [vmem:[#allocation4 + $0x78] sm:$0xff] }
 0xcba   :  { %v2735_v19 = vpop.eup %2734 }
 0xd21   :  { %v1051_v2 = vpop.permute.xlu0 %1050 }
 0xd22   :  { %v1053_v4 = vadd.f32 %v1051_v2, %v1047_v61  ;;  %v2516_v2 = vpack.c.bf16 %v1206_v16, %v1204_v1 }
 0xd24   :  { %2736 = vtanh.f32 %v1053_v4  ;;  %v1172_v27 = vrot.slane %v1053_v4, 6  ;;  %v1203_v4 = vld [vmem:[#allocation4 + $0x60] sm:$0xff] }
 0xd2e   :  { %v2737_v5 = vpop.eup %2736 }
 0xd2f   :  { %v1055_v23 = vmul.f32 %v2737_v5, %v2735_v19  ;;  %v1205_v19 = vld [vmem:[#allocation4 + $0x70] sm:$0xff] }
 0xd30   :  { %v2518_v5 = vpack.c.bf16 %v1205_v19, %v1203_v4 }
 0xd31   :  { %v1074_v7 = vrot.slane %v1055_v23, 4 }
 0xd33   :  { %1075 = vrot.lane.b32.xlu1 %v1074_v7, %s2899_s3  ;;  %v1307_v7 = vld [vmem:[#allocation6 + $0x8] sm:$0xff] }
 0xd37   :  { %425 = vrot.lane.b32.xlu1 %v3134_v3, %s2899_s3 }
 0xd3b   :  { %683 = vrot.lane.b32.xlu1 %v3172_v20, %s2899_s3 }
 0xd3f   :  { %1057 = vrot.lane.b32.xlu1 %v1055_v23, %s2899_s3 }
 0xda5   :  { %v1076_v26 = vpop.permute.xlu1 %1075 }
 0xda6   :  { %2340 = vmatmul.mubr.msk.f32.vlgmr.msra.gmra.mrb[10].mxu0 %vm199_vm5, %v1076_v26  ;;  %v1309_v26 = vld [vmem:[#allocation6 + $0x18] sm:$0xff] }
 0xda7   :  { %1398 = vmatprep.mubr.f32.mxu0 %v2898_v0 }
 0xda9   :  { %v426_v28 = vpop.permute.xlu1 %425 }
 0xdaa   :  { %429 = vst.msk [vmem:[#allocation2] sm:$0xc] %vm428_vm6, %v426_v28 }
 0xdab   :  { %431 = vst.msk [vmem:[#allocation2 + $0xa] sm:$0xc] %vm430_vm7, %v426_v28  ;;  %v1306_v28 = vld [vmem:[#allocation6] sm:$0xff] }
 0xdac   :  { %v3252_v35 = vpack.c.bf16 %v1308_v8, %v1306_v28 }
 0xdad   :  { %v684_v3 = vpop.permute.xlu1 %683 }
 0xdae   :  { %687 = vst.msk [vmem:[#allocation2] sm:$0xc0] %vm686_vm8, %v684_v3 }
 0xdaf   :  { %689 = vst.msk [vmem:[#allocation2 + $0x2] sm:$0xc0] %vm688_vm9, %v684_v3 }
 0xdb0   :  { %809 = vst.msk [vmem:[#allocation2 + $0x8] sm:$0x3] %vm302_vm3, %v3191_v62 }
 0xdb1   :  { %810 = vst.msk [vmem:[#allocation2 + $0x6] sm:$0x3] %vm304_vm4, %v3191_v62  ;;  %v1058_v20 = vpop.permute.xlu1 %1057  ;;  %v1065_v62 = vld [vmem:[#allocation3 + $0x8] sm:$0x3] }
 0xdb2   :  { %1060 = vst.msk [vmem:[#allocation2 + $0x8] sm:$0x30] %vm557_vm10, %v1058_v20  ;;  %v1069_v17 = vrot.slane %v1065_v62, 2  ;;  %v1315_v62 = vld [vmem:[#allocation6 + $0x48] sm:$0xff] }
 0xdb3   :  { %1061 = vst.msk [vmem:[#allocation2 - $0x2] sm:$0x30] %vm559_vm11, %v1058_v20  ;;  %v3250_v20 = vpack.c.bf16 %v1309_v26, %v1307_v7 }
 0xdb4   :  { %v1073_v18 = vsel %vm3109_vm2, %v1063_v14, %v1069_v17  ;;  %v1317_v14 = vld [vmem:[#allocation6 + $0x58] sm:$0xff] }
 0xdb5   :  { %2521 = vmatprep.subr.bf16.mxu0 %v3250_v20  ;;  %v3262_v17 = vpack.c.bf16 %v1317_v14, %v1315_v62 }
 0xdb6   :  { %2523 = vmatpush1.bf16.msra.mxu0 %v3252_v35 }
 0xe79   :  { %v1145_v38 = vpop.f32.mrb[10].mxu0 }
 0xe7a   :  { %v1152_v9 = vrot.slane %v1145_v38, 2  ;;  %v1147_v10 = vpop.f32.mrb[11].mxu0 }
 0xe7b   :  { %v1153_v15 = vrot.slane %v1147_v10, 2  ;;  %v1313_v10 = vld [vmem:[#allocation6 + $0x38] sm:$0xff] }
 0xe7c   :  { %v1156_v12 = vadd.f32 %v1152_v9, %v1072_v11  ;;  %v1311_v9 = vld [vmem:[#allocation6 + $0x28] sm:$0xff]  ;;  %v1310_v11 = vld [vmem:[#allocation6 + $0x20] sm:$0xff] }
 0xe7d   :  { %v1157_v21 = vadd.f32 %v1153_v15, %v1073_v18  ;;  %v1314_v18 = vld [vmem:[#allocation6 + $0x40] sm:$0xff] }
 0xe7e   :  { %v2341_v13 = vmul.f32 -1.442695, %v1156_v12  ;;  %v3258_v12 = vpack.c.bf16 %v1313_v10, %v1311_v9 }
 0xe7f   :  { %v2342_v52 = vmul.f32 -1.442695, %v1157_v21 }
 0xe80   :  { %2738 = vpow2.f32 %v2341_v13  ;;  %v1312_v13 = vld [vmem:[#allocation6 + $0x30] sm:$0xff]  ;;  %2525 = vmatprep.subr.bf16.mxu0 %v3258_v12 }
 0xe81   :  { %2740 = vtanh.f32 %v1157_v21  ;;  %v3260_v15 = vpack.c.bf16 %v1312_v13, %v1310_v11  ;;  %v1316_v21 = vld [vmem:[#allocation6 + $0x50] sm:$0xff] }
 0xe83   :  { %2527 = vmatpush1.bf16.msra.mxu0 %v3260_v15 }
 0xe84   :  { %2529 = vmatprep.subr.bf16.mxu0 %v3262_v17 }
 0xe8a   :  { %v2739_v22 = vpop.eup %2738 }
 0xe8b   :  { %v1164_v24 = vadd.f32 1.0, %v2739_v22  ;;  %v2741_v25 = vpop.eup %2740  ;;  %v1319_v22 = vld [vmem:[#allocation6 + $0x68] sm:$0xff] }
 0xe8d   :  { %2742 = vrcp.f32 %v1164_v24  ;;  %v1321_v24 = vld [vmem:[#allocation6 + $0x78] sm:$0xff] }
 0xe8e   :  { %2744 = vpow2.f32 %v2342_v52 }
 0xe97   :  { %v2743_v30 = vpop.eup %2742 }
 0xe98   :  { %v1175_v31 = vmul.f32 %v2743_v30, %v2741_v25  ;;  %v1174_v32 = vmul.f32 %v2743_v30, %v1172_v27  ;;  %v2745_v53 = vpop.eup %2744  ;;  %v3266_v25 = vpack.c.bf16 %v1316_v21, %v1314_v18  ;;  %v3269_v27 = vpack.c.bf16 %v1321_v24, %v1319_v22  ;;  %v1318_v30 = vld [vmem:[#allocation6 + $0x60] sm:$0xff] }
 0xe99   :  { %v1165_v54 = vadd.f32 1.0, %v2745_v53 }
 0xe9a   :  { %1177 = vrot.lane.b32.xlu0 %v1175_v31, %s2899_s3  ;;  %v1320_v31 = vld [vmem:[#allocation6 + $0x70] sm:$0xff]  ;;  %2531 = vmatpush1.bf16.msra.mxu0 %v3266_v25 }
 0xe9b   :  { %2746 = vrcp.f32 %v1165_v54  ;;  %2533 = vmatprep.subr.bf16.mxu0 %v3269_v27 }
 0xe9e   :  { %554 = vrot.lane.b32.xlu0 %v3153_v47, %s2899_s3  ;;  %v1200_v47 = vld [vmem:[#allocation4 + $0x48] sm:$0xff] }
 0xe9f   :  { %v2512_v61 = vpack.c.bf16 %v1202_v57, %v1200_v47 }
 0xea1   :  { %2513 = vmatprep.subr.bf16.mxu1 %v2512_v61 }
 0xea2   :  { %930 = vrot.lane.b32.xlu0 %v3208_v29, %s2899_s3  ;;  %v2514_v29 = vpack.c.bf16 %v1201_v63, %v1199_v58 }
 0xea4   :  { %2515 = vmatpush1.bf16.msra.mxu1 %v2514_v29 }
 0xea5   :  { %2517 = vmatprep.subr.bf16.mxu1 %v2516_v2  ;;  %v2747_v3 = vpop.eup %2746 }
 0xea8   :  { %2519 = vmatpush1.bf16.msra.mxu1 %v2518_v5 }
 0xea9   :  { %2537 = vmatprep.subr.bf16.mxu1 %v3250_v20 }
 0xf0c   :  { %v1178_v55 = vpop.permute.xlu0 %1177 }
 0xf0d   :  { %v1180_v56 = vadd.f32 %v1178_v55, %v1174_v32  ;;  %v3272_v32 = vpack.c.bf16 %v1320_v31, %v1318_v30 }
 0xf0f   :  { %2748 = vtanh.f32 %v1180_v56  ;;  %2535 = vmatpush1.bf16.msra.mxu0 %v3272_v32 }
 0xf10   :  { %v555_v59 = vpop.permute.xlu0 %554  ;;  %2553 = vmatprep.subr.bf16.mxu0 %v3250_v20 }
 0xf11   :  { %558 = vst.msk [vmem:[#allocation2] sm:$0x30] %vm557_vm10, %v555_v59 }
 0xf12   :  { %560 = vst.msk [vmem:[#allocation2 + $0x6] sm:$0x30] %vm559_vm11, %v555_v59  ;;  %1399 = vmatmul.mubr.f32.vlgmr.msra.gmra.mrb[12].mxu0 %v2898_v0 }
 0xf13   :  { %2555 = vmatpush1.bf16.msra.mxu0 %v3252_v35  ;;  %1640 = vmatprep.mubr.f32.mxu0 %v2898_v0 }
 0xf14   :  { %v931_v23 = vpop.permute.xlu0 %930  ;;  %2557 = vmatprep.subr.bf16.mxu0 %v3258_v12 }
 0xf15   :  { %933 = vst.msk [vmem:[#allocation2 + $0x8] sm:$0xc] %vm428_vm6, %v931_v23 }
 0xf16   :  { %934 = vst.msk [vmem:[#allocation2 + $0x2] sm:$0xc] %vm430_vm7, %v931_v23 }
 0xf17   :  { %2559 = vmatpush1.bf16.msra.mxu0 %v3260_v15 }
 0xf18   :  { %2561 = vmatprep.subr.bf16.mxu0 %v3262_v17 }
 0xf19   :  { %v2749_v33 = vpop.eup %2748 }
 0xf1a   :  { %v1182_v38 = vmul.f32 %v2749_v33, %v2747_v3 }
 0xf1b   :  { %2563 = vmatpush1.bf16.msra.mxu0 %v3266_v25 }
 0xf1c   :  { %1184 = vrot.lane.b32.xlu0 %v1182_v38, %s2899_s3  ;;  %2565 = vmatprep.subr.bf16.mxu0 %v3269_v27 }
 0xf1f   :  { %2567 = vmatpush1.bf16.msra.mxu0 %v3272_v32 }
 0xf20   :  { %2585 = vmatprep.subr.bf16.mxu0 %v3250_v20 }
 0xf8e   :  { %v1185_v34 = vpop.permute.xlu0 %1184 }
 0xf8f   :  { %1187 = vst.msk [vmem:[#allocation2 + $0x8] sm:$0xc0] %vm686_vm8, %v1185_v34 }
 0xf90   :  { %1188 = vst.msk [vmem:[#allocation2 - $0x6] sm:$0xc0] %vm688_vm9, %v1185_v34 }
 0xf96   :  { %v1190_v37 = vld [vmem:[#allocation2 + $0x8] sm:$0xff] }
 0xf97   :  { %v1189_v36 = vld [vmem:[#allocation2] sm:$0xff] }
 0xf98   :  { %2343 = vmatmul.mubr.msk.f32.vlgmr.msra.gmra.mrb[8].mxu1 %vm199_vm5, %v1189_v36 }
 0xf99   :  { %1295 = vmatprep.mubr.f32.mxu1 %v2898_v0  ;;  %2539 = vmatpush1.bf16.msra.mxu1 %v3252_v35 }
 0xf9a   :  { %2541 = vmatprep.subr.bf16.mxu1 %v3258_v12 }
 0xf9c   :  { %2344 = vmatmul.mubr.msk.f32.gmra.mrb[10].mxu1 %vm199_vm5, %v1190_v37 }
 0xf9d   :  { %2543 = vmatpush1.bf16.msra.mxu1 %v3260_v15  ;;  %1513 = vmatprep.mubr.f32.mxu1 %v2898_v0 }
 0xf9e   :  { %2545 = vmatprep.subr.bf16.mxu1 %v3262_v17 }
 0xfa1   :  { %2547 = vmatpush1.bf16.msra.mxu1 %v3266_v25 }
 0xfa2   :  { %2549 = vmatprep.subr.bf16.mxu1 %v3269_v27 }
 0xfa5   :  { %2551 = vmatpush1.bf16.msra.mxu1 %v3272_v32 }
 0xfa6   :  { %2569 = vmatprep.subr.bf16.mxu1 %v3250_v20 }
 0xfe5   :  { %v1400_v39 = vpop.f32.mrb[12].mxu0 }
 0xfe6   :  { %v1402_v42 = vpop.f32.mrb[13].mxu0 }
0x106b   :  { %v1291_v48 = vpop.f32.mrb[8].mxu1 }
0x106c   :  { %v1292_v49 = vadd.f32 %v1291_v48, %v1212_v45  ;;  %v1293_v50 = vpop.f32.mrb[9].mxu1 }
0x106d   :  { %v1294_v51 = vadd.f32 %v1293_v50, %v1216_v46 }
0x106e   :  { %1302 = vst [vmem:[#allocation3] sm:$0xff] %v1292_v49 }
0x106f   :  { %1303 = vst [vmem:[#allocation3 + $0x8] sm:$0xff] %v1294_v51  ;;  %v1297_v52 = vpop.f32.mrb[10].mxu1 }
0x1070   :  { %v1298_v53 = vadd.f32 %v1297_v52, %v1212_v45  ;;  %v1299_v54 = vpop.f32.mrb[11].mxu1 }
0x1071   :  { %v1300_v55 = vadd.f32 %v1299_v54, %v1216_v46 }
0x1072   :  { %1304 = vst [vmem:[#allocation3 + $0x10] sm:$0xff] %v1298_v53 }
0x1073   :  { %1305 = vst [vmem:[#allocation3 + $0x18] sm:$0xff] %v1300_v55 }
0x1075   :  { %v1322_v57 = vld [vmem:[#allocation3] sm:$0x3]  ;;  %v1435_v62 = vld [vmem:[#allocation3] sm:$0xc] }
0x1076   :  { %v1323_v61 = vld [vmem:[#allocation3 + $0x8] sm:$0x3]  ;;  %v1436_v36 = vld [vmem:[#allocation3 + $0x8] sm:$0xc] }
0x1079   :  { %v1324_v56 = vld [vmem:[#allocation3 + $0x10] sm:$0xc0]  ;;  %v1437_v10 = vld [vmem:[#allocation3 + $0x10] sm:$0x30] }
0x107a   :  { %v1328_v47 = vrot.slane %v1324_v56, 6  ;;  %v1325_v58 = vld [vmem:[#allocation3 + $0x18] sm:$0xc0]  ;;  %v1441_v11 = vrot.slane %v1437_v10, 2  ;;  %v1438_v30 = vld [vmem:[#allocation3 + $0x18] sm:$0x30] }
0x107b   :  { %v1329_v59 = vrot.slane %v1325_v58, 6  ;;  %v1442_v31 = vrot.slane %v1438_v30, 2 }
0x107c   :  { %v1332_v41 = vsel %vm3103_vm1, %v1322_v57, %v1328_v47  ;;  %v1445_v21 = vsel %vm3103_vm1, %v1435_v62, %v1441_v11 }
0x107d   :  { %v1405_v40 = vadd.f32 %v1400_v39, %v1332_v41  ;;  %v1333_v63 = vsel %vm3109_vm2, %v1323_v61, %v1329_v59  ;;  %v1446_v37 = vsel %vm3109_vm2, %v1436_v36, %v1442_v31  ;;  %v1559_v61 = vld [vmem:[#allocation3] sm:$0x30] }
0x107e   :  { %v1406_v1 = vadd.f32 %v1402_v42, %v1333_v63 }
0x107f   :  { %v2345_v43 = vmul.f32 -1.442695, %v1405_v40 }
0x1080   :  { %v2346_v5 = vmul.f32 -1.442695, %v1406_v1 }
0x1081   :  { %2750 = vpow2.f32 %v2345_v43  ;;  %v1561_v43 = vld [vmem:[#allocation3 + $0x10] sm:$0xc] }
0x1082   :  { %2752 = vtanh.f32 %v1406_v1  ;;  %v1565_v58 = vrot.slane %v1561_v43, 6 }
0x108b   :  { %v2751_v16 = vpop.eup %2750 }
0x108c   :  { %v1413_v29 = vadd.f32 1.0, %v2751_v16  ;;  %v2753_v2 = vpop.eup %2752  ;;  %v1569_v16 = vsel %vm3103_vm1, %v1559_v61, %v1565_v58 }
0x108e   :  { %2754 = vrcp.f32 %v1413_v29 }
0x108f   :  { %2756 = vpow2.f32 %v2346_v5 }
0x1098   :  { %v2755_v4 = vpop.eup %2754 }
0x1099   :  { %v1421_v19 = vmul.f32 %v2755_v4, %v2753_v2  ;;  %v2757_v23 = vpop.eup %2756  ;;  %v1420_v26 = vmul.f32 0.0, %v2755_v4  ;;  %v1562_v4 = vld [vmem:[#allocation3 + $0x18] sm:$0xc] }
0x109a   :  { %v1414_v7 = vadd.f32 1.0, %v2757_v23  ;;  %v1560_v23 = vld [vmem:[#allocation3 + $0x8] sm:$0x30] }
0x109b   :  { %1423 = vrot.lane.b32.xlu1 %v1421_v19, %s2899_s3  ;;  %v1566_v19 = vrot.slane %v1562_v4, 6 }
0x109c   :  { %2758 = vrcp.f32 %v1414_v7 }
0x109d   :  { %v1570_v7 = vsel %vm3109_vm2, %v1560_v23, %v1566_v19  ;;  %v1813_v23 = vld [vmem:[#allocation3 + $0x10] sm:$0x3] }
0x10a6   :  { %v2759_v8 = vpop.eup %2758 }
0x110d   :  { %v1424_v28 = vpop.permute.xlu1 %1423 }
0x110e   :  { %v1426_v3 = vadd.f32 %v1424_v28, %v1420_v26 }
0x1110   :  { %2760 = vtanh.f32 %v1426_v3  ;;  %v1542_v46 = vrot.slane %v1426_v3, 6 }
0x111a   :  { %v2761_v33 = vpop.eup %2760 }
0x111b   :  { %v1428_v38 = vmul.f32 %v2761_v33, %v2759_v8 }
0x111d   :  { %1430 = vrot.lane.b32.xlu0 %v1428_v38, %s2899_s3 }
0x118f   :  { %v1431_v9 = vpop.permute.xlu0 %1430 }
0x1190   :  { %1433 = vst.msk [vmem:[%s3503_s7] sm:$0x3] %vm302_vm3, %v1431_v9  ;;  %2347 = vmatmul.mubr.msk.f32.vlgmr.msra.gmra.mrb[12].mxu1 %vm199_vm5, %v1431_v9 }
0x1191   :  { %1434 = vst.msk [vmem:[%s3503_s7 + $0xe] sm:$0x3] %vm304_vm4, %v1431_v9  ;;  %2571 = vmatpush1.bf16.msra.mxu1 %v3252_v35  ;;  %1767 = vmatprep.mubr.f32.mxu1 %v2898_v0 }
0x1192   :  { %2573 = vmatprep.subr.bf16.mxu1 %v3258_v12 }
0x1195   :  { %2575 = vmatpush1.bf16.msra.mxu1 %v3260_v15 }
0x1196   :  { %2577 = vmatprep.subr.bf16.mxu1 %v3262_v17 }
0x1199   :  { %2579 = vmatpush1.bf16.msra.mxu1 %v3266_v25 }
0x119a   :  { %2581 = vmatprep.subr.bf16.mxu1 %v3269_v27 }
0x119d   :  { %2583 = vmatpush1.bf16.msra.mxu1 %v3272_v32 }
0x119e   :  { %2601 = vmatprep.subr.bf16.mxu1 %v3250_v20 }
0x1263   :  { %v1515_v13 = vpop.f32.mrb[12].mxu1 }
0x1264   :  { %v1522_v14 = vrot.slane %v1515_v13, 6  ;;  %v1517_v18 = vpop.f32.mrb[13].mxu1 }
0x1265   :  { %v1523_v34 = vrot.slane %v1517_v18, 6 }
0x1266   :  { %v1526_v22 = vadd.f32 %v1522_v14, %v1445_v21 }
0x1267   :  { %v1527_v39 = vadd.f32 %v1523_v34, %v1446_v37  ;;  %v1688_v34 = vld [vmem:[#allocation3 + $0x10] sm:$0x3] }
0x1268   :  { %v2348_v24 = vmul.f32 -1.442695, %v1526_v22  ;;  %v1692_v36 = vrot.slane %v1688_v34, 2 }
0x1269   :  { %v2349_v51 = vmul.f32 -1.442695, %v1527_v39 }
0x126a   :  { %2762 = vpow2.f32 %v2348_v24 }
0x126b   :  { %2764 = vtanh.f32 %v1527_v39  ;;  %v1686_v39 = vld [vmem:[#allocation3] sm:$0xc0] }
0x1274   :  { %v2763_v42 = vpop.eup %2762 }
0x1275   :  { %v1534_v44 = vadd.f32 1.0, %v2763_v42  ;;  %v2765_v45 = vpop.eup %2764 }
0x1277   :  { %2766 = vrcp.f32 %v1534_v44 }
0x1278   :  { %2768 = vpow2.f32 %v2349_v51 }
0x1281   :  { %v2767_v48 = vpop.eup %2766 }
0x1282   :  { %v1545_v49 = vmul.f32 %v2767_v48, %v2765_v45  ;;  %v1544_v50 = vmul.f32 %v2767_v48, %v1542_v46  ;;  %v2769_v52 = vpop.eup %2768  ;;  %v1696_v45 = vsel %vm3103_vm1, %v1686_v39, %v1692_v36 }
0x1283   :  { %v1535_v53 = vadd.f32 1.0, %v2769_v52  ;;  %v1687_v52 = vld [vmem:[#allocation3 + $0x8] sm:$0xc0] }
0x1284   :  { %1547 = vrot.lane.b32.xlu1 %v1545_v49, %s2899_s3  ;;  %v1689_v49 = vld [vmem:[#allocation3 + $0x18] sm:$0x3] }
0x1285   :  { %2770 = vrcp.f32 %v1535_v53 }
0x128f   :  { %v2771_v56 = vpop.eup %2770 }
0x12f6   :  { %v1548_v54 = vpop.permute.xlu1 %1547 }
0x12f7   :  { %v1550_v55 = vadd.f32 %v1548_v54, %v1544_v50  ;;  %v1693_v50 = vrot.slane %v1689_v49, 2  ;;  %v1936_v49 = vld [vmem:[#allocation3] sm:$0x30] }
0x12f9   :  { %2772 = vtanh.f32 %v1550_v55  ;;  %v1669_v33 = vrot.slane %v1550_v55, 6  ;;  %v1697_v53 = vsel %vm3109_vm2, %v1687_v52, %v1693_v50  ;;  %v1934_v50 = vld [vmem:[#allocation3 + $0x10] sm:$0xc] }
0x1303   :  { %v2773_v47 = vpop.eup %2772 }
0x1304   :  { %v3337_v57 = vmul.f32 %v2773_v47, %v2771_v56 }
0x1306   :  { %v1571_v41 = vrot.slane %v3337_v57, 2 }
0x1308   :  { %1572 = vrot.lane.b32.xlu0 %v1571_v41, %s2899_s3 }
0x137a   :  { %v1573_v40 = vpop.permute.xlu0 %1572 }
0x137b   :  { %2350 = vmatmul.mubr.msk.f32.vlgmr.msra.gmra.mrb[14].mxu0 %vm199_vm5, %v1573_v40 }
0x137c   :  { %2587 = vmatpush1.bf16.msra.mxu0 %v3252_v35  ;;  %1894 = vmatprep.mubr.f32.mxu0 %v2898_v0 }
0x137d   :  { %2589 = vmatprep.subr.bf16.mxu0 %v3258_v12 }
0x1380   :  { %2591 = vmatpush1.bf16.msra.mxu0 %v3260_v15 }
0x1381   :  { %2593 = vmatprep.subr.bf16.mxu0 %v3262_v17 }
0x1384   :  { %2595 = vmatpush1.bf16.msra.mxu0 %v3266_v25 }
0x1385   :  { %2597 = vmatprep.subr.bf16.mxu0 %v3269_v27 }
0x1388   :  { %2599 = vmatpush1.bf16.msra.mxu0 %v3272_v32 }
0x1389   :  { %2617 = vmatprep.subr.bf16.mxu0 %v3250_v20 }
0x144e   :  { %v1642_v59 = vpop.f32.mrb[14].mxu0 }
0x144f   :  { %v1649_v63 = vrot.slane %v1642_v59, 4  ;;  %v1644_v1 = vpop.f32.mrb[15].mxu0 }
0x1450   :  { %v1650_v5 = vrot.slane %v1644_v1, 4 }
0x1451   :  { %v1653_v29 = vadd.f32 %v1649_v63, %v1569_v16 }
0x1452   :  { %v1654_v26 = vadd.f32 %v1650_v5, %v1570_v7  ;;  %v1815_v5 = vld [vmem:[#allocation3] sm:$0xc0] }
0x1453   :  { %v2351_v2 = vmul.f32 -1.442695, %v1653_v29  ;;  %v1819_v7 = vrot.slane %v1815_v5, 6 }
0x1454   :  { %v2352_v11 = vmul.f32 -1.442695, %v1654_v26 }
0x1455   :  { %2774 = vpow2.f32 %v2351_v2 }
0x1456   :  { %2776 = vtanh.f32 %v1654_v26  ;;  %v1823_v26 = vsel %vm3103_vm1, %v1813_v23, %v1819_v7  ;;  %v2060_v7 = vld [vmem:[#allocation3] sm:$0xc] }
0x145f   :  { %v2775_v28 = vpop.eup %2774 }
0x1460   :  { %v1661_v3 = vadd.f32 1.0, %v2775_v28  ;;  %v2777_v8 = vpop.eup %2776 }
0x1462   :  { %2778 = vrcp.f32 %v1661_v3 }
0x1463   :  { %2780 = vpow2.f32 %v2352_v11 }
0x146c   :  { %v2779_v38 = vpop.eup %2778 }
0x146d   :  { %v1672_v9 = vmul.f32 %v2779_v38, %v2777_v8  ;;  %v1671_v10 = vmul.f32 %v2779_v38, %v1669_v33  ;;  %v2781_v13 = vpop.eup %2780  ;;  %v1816_v38 = vld [vmem:[#allocation3 + $0x8] sm:$0xc0] }
0x146e   :  { %v1662_v62 = vadd.f32 1.0, %v2781_v13 }
0x146f   :  { %1674 = vrot.lane.b32.xlu1 %v1672_v9, %s2899_s3  ;;  %v1814_v9 = vld [vmem:[#allocation3 + $0x18] sm:$0x3] }
0x1470   :  { %2782 = vrcp.f32 %v1662_v62 }
0x147a   :  { %v2783_v21 = vpop.eup %2782 }
0x14e1   :  { %v1675_v14 = vpop.permute.xlu1 %1674 }
0x14e2   :  { %v1677_v18 = vadd.f32 %v1675_v14, %v1671_v10  ;;  %v1820_v10 = vrot.slane %v1816_v38, 6 }
0x14e4   :  { %2784 = vtanh.f32 %v1677_v18  ;;  %v1796_v47 = vrot.slane %v1677_v18, 6  ;;  %v1824_v11 = vsel %vm3109_vm2, %v1814_v9, %v1820_v10 }
0x14ee   :  { %v2785_v22 = vpop.eup %2784 }
0x14ef   :  { %v3356_v24 = vmul.f32 %v2785_v22, %v2783_v21 }
0x14f1   :  { %v1698_v30 = vrot.slane %v3356_v24, 4 }
0x14f3   :  { %1699 = vrot.lane.b32.xlu0 %v1698_v30, %s2899_s3 }
0x1565   :  { %v1700_v31 = vpop.permute.xlu0 %1699 }
0x1566   :  { %2353 = vmatmul.mubr.msk.f32.vlgmr.msra.gmra.mrb[14].mxu1 %vm199_vm5, %v1700_v31 }
0x1567   :  { %2603 = vmatpush1.bf16.msra.mxu1 %v3252_v35  ;;  %2012 = vmatprep.mubr.f32.mxu1 %v2898_v0 }
0x1568   :  { %2605 = vmatprep.subr.bf16.mxu1 %v3258_v12 }
0x156b   :  { %2607 = vmatpush1.bf16.msra.mxu1 %v3260_v15 }
0x156c   :  { %2609 = vmatprep.subr.bf16.mxu1 %v3262_v17 }
0x156f   :  { %2611 = vmatpush1.bf16.msra.mxu1 %v3266_v25 }
0x1570   :  { %2613 = vmatprep.subr.bf16.mxu1 %v3269_v27 }
0x1573   :  { %2615 = vmatpush1.bf16.msra.mxu1 %v3272_v32 }
0x1574   :  { %2633 = vmatprep.subr.bf16.mxu1 %v3250_v20 }
0x1639   :  { %v1769_v37 = vpop.f32.mrb[14].mxu1 }
0x163a   :  { %v1776_v42 = vrot.slane %v1769_v37, 2  ;;  %v1771_v44 = vpop.f32.mrb[15].mxu1 }
0x163b   :  { %v1777_v51 = vrot.slane %v1771_v44, 2 }
0x163c   :  { %v1780_v46 = vadd.f32 %v1776_v42, %v1696_v45 }
0x163d   :  { %v1781_v20 = vadd.f32 %v1777_v51, %v1697_v53  ;;  %v1940_v51 = vrot.slane %v1936_v49, 2 }
0x163e   :  { %v2354_v48 = vmul.f32 -1.442695, %v1780_v46 }
0x163f   :  { %v2355_v58 = vmul.f32 -1.442695, %v1781_v20 }
0x1640   :  { %2786 = vpow2.f32 %v2354_v48 }
0x1641   :  { %2788 = vtanh.f32 %v1781_v20 }
0x164a   :  { %v2787_v54 = vpop.eup %2786 }
0x164b   :  { %v1788_v55 = vadd.f32 1.0, %v2787_v54  ;;  %v2789_v56 = vpop.eup %2788 }
0x164d   :  { %2790 = vrcp.f32 %v1788_v55 }
0x164e   :  { %2792 = vpow2.f32 %v2355_v58 }
0x1657   :  { %v2791_v41 = vpop.eup %2790 }
0x1658   :  { %v1799_v40 = vmul.f32 %v2791_v41, %v2789_v56  ;;  %v1798_v43 = vmul.f32 %v2791_v41, %v1796_v47  ;;  %v2793_v59 = vpop.eup %2792 }
0x1659   :  { %v1789_v61 = vadd.f32 1.0, %v2793_v59 }
0x165a   :  { %1801 = vrot.lane.b32.xlu1 %v1799_v40, %s2899_s3 }
0x165b   :  { %2794 = vrcp.f32 %v1789_v61 }
0x1665   :  { %v2795_v16 = vpop.eup %2794 }
0x16cc   :  { %v1802_v63 = vpop.permute.xlu1 %1801 }
0x16cd   :  { %v1804_v1 = vadd.f32 %v1802_v63, %v1798_v43 }
0x16cf   :  { %2796 = vtanh.f32 %v1804_v1  ;;  %v1917_v21 = vrot.slane %v1804_v1, 6 }
0x16d9   :  { %v2797_v29 = vpop.eup %2796 }
0x16da   :  { %v3375_v2 = vmul.f32 %v2797_v29, %v2795_v16 }
0x16dc   :  { %v1825_v4 = vrot.slane %v3375_v2, 6 }
0x16de   :  { %1826 = vrot.lane.b32.xlu0 %v1825_v4, %s2899_s3 }
0x1750   :  { %v1827_v19 = vpop.permute.xlu0 %1826 }
0x1751   :  { %2356 = vmatmul.mubr.msk.f32.vlgmr.msra.gmra.mrb[16].mxu0 %vm199_vm5, %v1827_v19 }
0x1752   :  { %2619 = vmatpush1.bf16.msra.mxu0 %v3252_v35  ;;  %2139 = vmatprep.mubr.f32.mxu0 %v2898_v0 }
0x1753   :  { %2621 = vmatprep.subr.bf16.mxu0 %v3258_v12 }
0x1756   :  { %2623 = vmatpush1.bf16.msra.mxu0 %v3260_v15 }
0x1757   :  { %2625 = vmatprep.subr.bf16.mxu0 %v3262_v17 }
0x175a   :  { %2627 = vmatpush1.bf16.msra.mxu0 %v3266_v25 }
0x175b   :  { %2629 = vmatprep.subr.bf16.mxu0 %v3269_v27 }
0x175e   :  { %2631 = vmatpush1.bf16.msra.mxu0 %v3272_v32 }
0x1824   :  { %v1896_v28 = vpop.f32.mrb[16].mxu0 }
0x1825   :  { %v1901_v3 = vadd.f32 %v1896_v28, %v1823_v26  ;;  %v1898_v8 = vpop.f32.mrb[17].mxu0  ;;  %v2058_v26 = vld [vmem:[#allocation3 + $0x10] sm:$0x30]  ;;  %v2064_v28 = vrot.slane %v2060_v7, 6 }
0x1826   :  { %v1902_v13 = vadd.f32 %v1898_v8, %v1824_v11  ;;  %v2061_v11 = vld [vmem:[#allocation3 + $0x8] sm:$0xc] }
0x1827   :  { %v2357_v33 = vmul.f32 -1.442695, %v1901_v3  ;;  %v2068_v38 = vsel %vm3103_vm1, %v2058_v26, %v2064_v28 }
0x1828   :  { %v2358_v34 = vmul.f32 -1.442695, %v1902_v13 }
0x1829   :  { %2798 = vpow2.f32 %v2357_v33 }
0x182a   :  { %2800 = vtanh.f32 %v1902_v13  ;;  %v2059_v13 = vld [vmem:[#allocation3 + $0x18] sm:$0x30] }
0x1833   :  { %v2799_v62 = vpop.eup %2798 }
0x1834   :  { %v1909_v14 = vadd.f32 1.0, %v2799_v62  ;;  %v2801_v18 = vpop.eup %2800 }
0x1836   :  { %2802 = vrcp.f32 %v1909_v14  ;;  %v2065_v14 = vrot.slane %v2061_v11, 6 }
0x1837   :  { %2804 = vpow2.f32 %v2358_v34 }
0x1840   :  { %v2803_v22 = vpop.eup %2802 }
0x1841   :  { %v1920_v30 = vmul.f32 %v2803_v22, %v2801_v18  ;;  %v1919_v31 = vmul.f32 %v2803_v22, %v1917_v21  ;;  %v2805_v36 = vpop.eup %2804  ;;  %v2069_v18 = vsel %vm3109_vm2, %v2059_v13, %v2065_v14 }
0x1842   :  { %v1910_v37 = vadd.f32 1.0, %v2805_v36 }
0x1843   :  { %1922 = vrot.lane.b32.xlu1 %v1920_v30, %s2899_s3 }
0x1844   :  { %2806 = vrcp.f32 %v1910_v37 }
0x184e   :  { %v2807_v44 = vpop.eup %2806 }
0x18b5   :  { %v1923_v39 = vpop.permute.xlu1 %1922 }
0x18b6   :  { %v1925_v42 = vadd.f32 %v1923_v39, %v1919_v31 }
0x18b8   :  { %2808 = vtanh.f32 %v1925_v42  ;;  %v2041_v41 = vrot.slane %v1925_v42, 6 }
0x18c2   :  { %v2809_v45 = vpop.eup %2808 }
0x18c3   :  { %v1927_v46 = vmul.f32 %v2809_v45, %v2807_v44 }
0x18c5   :  { %1929 = vrot.lane.b32.xlu0 %v1927_v46, %s2899_s3 }
0x1937   :  { %v3394_v48 = vpop.permute.xlu0 %1929 }
0x1938   :  { %2359 = vmatmul.mubr.msk.f32.vlgmr.msra.gmra.mrb[16].mxu1 %vm199_vm5, %v3394_v48 }
0x1939   :  { %2635 = vmatpush1.bf16.msra.mxu1 %v3252_v35  ;;  %2266 = vmatprep.mubr.f32.mxu1 %v2898_v0  ;;  %v1944_v0 = vsel %vm3103_vm1, %v1934_v50, %v1940_v51 }
0x193a   :  { %2637 = vmatprep.subr.bf16.mxu1 %v3258_v12 }
0x193d   :  { %2639 = vmatpush1.bf16.msra.mxu1 %v3260_v15  ;;  %v1937_v15 = vld [vmem:[#allocation3 + $0x8] sm:$0x30] }
0x193e   :  { %2641 = vmatprep.subr.bf16.mxu1 %v3262_v17  ;;  %v1935_v17 = vld [vmem:[#allocation3 + $0x18] sm:$0xc] }
0x1941   :  { %2643 = vmatpush1.bf16.msra.mxu1 %v3266_v25  ;;  %v1941_v25 = vrot.slane %v1937_v15, 2 }
0x1942   :  { %2645 = vmatprep.subr.bf16.mxu1 %v3269_v27 }
0x1943   :  { %v1945_v27 = vsel %vm3109_vm2, %v1935_v17, %v1941_v25 }
0x1945   :  { %2647 = vmatpush1.bf16.msra.mxu1 %v3272_v32 }
0x1a0b   :  { %v2014_v52 = vpop.f32.mrb[16].mxu1 }
0x1a0c   :  { %v2021_v53 = vrot.slane %v2014_v52, 6  ;;  %v2016_v35 = vpop.f32.mrb[17].mxu1 }
0x1a0d   :  { %v2022_v54 = vrot.slane %v2016_v35, 6 }
0x1a0e   :  { %v2025_v12 = vadd.f32 %v2021_v53, %v1944_v0 }
0x1a0f   :  { %v2026_v32 = vadd.f32 %v2022_v54, %v1945_v27 }
0x1a10   :  { %v2360_v20 = vmul.f32 -1.442695, %v2025_v12  ;;  %v2187_v12 = vld [vmem:[#allocation3] sm:$0x3] }
0x1a11   :  { %v2361_v59 = vmul.f32 -1.442695, %v2026_v32  ;;  %v2191_v15 = vrot.slane %v2187_v12, 2 }
0x1a12   :  { %2810 = vpow2.f32 %v2360_v20  ;;  %v2185_v20 = vld [vmem:[#allocation3 + $0x10] sm:$0xc0] }
0x1a13   :  { %2812 = vtanh.f32 %v2026_v32 }
0x1a1c   :  { %v2811_v55 = vpop.eup %2810 }
0x1a1d   :  { %v2033_v56 = vadd.f32 1.0, %v2811_v55  ;;  %v2813_v47 = vpop.eup %2812  ;;  %v2188_v55 = vld [vmem:[#allocation3 + $0x8] sm:$0x3] }
0x1a1f   :  { %2814 = vrcp.f32 %v2033_v56  ;;  %v2186_v56 = vld [vmem:[#allocation3 + $0x18] sm:$0xc0] }
0x1a20   :  { %2816 = vpow2.f32 %v2361_v59 }
0x1a29   :  { %v2815_v40 = vpop.eup %2814 }
0x1a2a   :  { %v2044_v43 = vmul.f32 %v2815_v40, %v2813_v47  ;;  %v2043_v58 = vmul.f32 %v2815_v40, %v2041_v41  ;;  %v2817_v61 = vpop.eup %2816  ;;  %v2192_v41 = vrot.slane %v2188_v55, 2 }
0x1a2b   :  { %v2034_v63 = vadd.f32 1.0, %v2817_v61 }
0x1a2c   :  { %2046 = vrot.lane.b32.xlu1 %v2044_v43, %s2899_s3  ;;  %v2196_v40 = vsel %vm3109_vm2, %v2186_v56, %v2192_v41 }
0x1a2d   :  { %2818 = vrcp.f32 %v2034_v63 }
0x1a37   :  { %v2819_v29 = vpop.eup %2818 }
0x1a9e   :  { %v2047_v1 = vpop.permute.xlu1 %2046 }
0x1a9f   :  { %v2049_v16 = vadd.f32 %v2047_v1, %v2043_v58 }
0x1aa1   :  { %2820 = vtanh.f32 %v2049_v16  ;;  %v2168_v34 = vrot.slane %v2049_v16, 6 }
0x1aab   :  { %v2821_v4 = vpop.eup %2820 }
0x1aac   :  { %v3411_v19 = vmul.f32 %v2821_v4, %v2819_v29 }
0x1aae   :  { %v2070_v5 = vrot.slane %v3411_v19, 2 }
0x1ab0   :  { %2071 = vrot.lane.b32.xlu0 %v2070_v5, %s2899_s3 }
0x1b22   :  { %v2072_v23 = vpop.permute.xlu0 %2071 }
0x1b23   :  { %2362 = vmatmul.mubr.msk.f32.vlgmr.msra.gmra.mrb[18].mxu0 %vm199_vm5, %v2072_v23 }
0x1bf6   :  { %v2141_v3 = vpop.f32.mrb[18].mxu0 }
0x1bf7   :  { %v2148_v8 = vrot.slane %v2141_v3, 4  ;;  %v2143_v33 = vpop.f32.mrb[19].mxu0 }
0x1bf8   :  { %v2149_v62 = vrot.slane %v2143_v33, 4 }
0x1bf9   :  { %v2152_v9 = vadd.f32 %v2148_v8, %v2068_v38 }
0x1bfa   :  { %v2153_v21 = vadd.f32 %v2149_v62, %v2069_v18 }
0x1bfb   :  { %v2363_v10 = vmul.f32 -1.442695, %v2152_v9 }
0x1bfc   :  { %v2364_v42 = vmul.f32 -1.442695, %v2153_v21 }
0x1bfd   :  { %2822 = vpow2.f32 %v2363_v10 }
0x1bfe   :  { %2824 = vtanh.f32 %v2153_v21 }
0x1c07   :  { %v2823_v22 = vpop.eup %2822 }
0x1c08   :  { %v2160_v30 = vadd.f32 1.0, %v2823_v22  ;;  %v2825_v31 = vpop.eup %2824 }
0x1c0a   :  { %2826 = vrcp.f32 %v2160_v30 }
0x1c0b   :  { %2828 = vpow2.f32 %v2364_v42 }
0x1c14   :  { %v2827_v36 = vpop.eup %2826 }
0x1c15   :  { %v2171_v37 = vmul.f32 %v2827_v36, %v2825_v31  ;;  %v2170_v39 = vmul.f32 %v2827_v36, %v2168_v34  ;;  %v2829_v44 = vpop.eup %2828 }
0x1c16   :  { %v2161_v45 = vadd.f32 1.0, %v2829_v44 }
0x1c17   :  { %2173 = vrot.lane.b32.xlu1 %v2171_v37, %s2899_s3 }
0x1c18   :  { %2830 = vrcp.f32 %v2161_v45 }
0x1c22   :  { %v2831_v50 = vpop.eup %2830 }
0x1c89   :  { %v2174_v46 = vpop.permute.xlu1 %2173 }
0x1c8a   :  { %v2176_v49 = vadd.f32 %v2174_v46, %v2170_v39 }
0x1c8c   :  { %2832 = vtanh.f32 %v2176_v49  ;;  %v2295_v63 = vrot.slane %v2176_v49, 6 }
0x1c96   :  { %v2833_v51 = vpop.eup %2832 }
0x1c97   :  { %v2178_v52 = vmul.f32 %v2833_v51, %v2831_v50 }
0x1c99   :  { %v2197_v53 = vrot.slane %v2178_v52, 4 }
0x1c9b   :  { %2198 = vrot.lane.b32.xlu0 %v2197_v53, %s2899_s3 }
0x1c9f   :  { %1554 = vrot.lane.b32.xlu0 %v3337_v57, %s2899_s3 }
0x1ca3   :  { %1808 = vrot.lane.b32.xlu0 %v3375_v2, %s2899_s3 }
0x1ca7   :  { %2180 = vrot.lane.b32.xlu0 %v2178_v52, %s2899_s3 }
0x1d0d   :  { %v2199_v35 = vpop.permute.xlu0 %2198 }
0x1d0e   :  { %2365 = vmatmul.mubr.msk.f32.vlgmr.msra.gmra.mrb[18].mxu1 %vm199_vm5, %v2199_v35 }
0x1d11   :  { %v1555_v0 = vpop.permute.xlu0 %1554 }
0x1d12   :  { %1557 = vst.msk [vmem:[%s3503_s7] sm:$0xc] %vm428_vm6, %v1555_v0 }
0x1d13   :  { %1558 = vst.msk [vmem:[%s3503_s7 + $0xa] sm:$0xc] %vm430_vm7, %v1555_v0 }
0x1d15   :  { %v1809_v57 = vpop.permute.xlu0 %1808 }
0x1d16   :  { %1811 = vst.msk [vmem:[%s3503_s7] sm:$0xc0] %vm686_vm8, %v1809_v57 }
0x1d17   :  { %1812 = vst.msk [vmem:[%s3503_s7 + $0x2] sm:$0xc0] %vm688_vm9, %v1809_v57 }
0x1d18   :  { %1932 = vst.msk [vmem:[%s3503_s7 + $0x8] sm:$0x3] %vm302_vm3, %v3394_v48 }
0x1d19   :  { %1933 = vst.msk [vmem:[%s3503_s7 + $0x6] sm:$0x3] %vm304_vm4, %v3394_v48  ;;  %v2181_v2 = vpop.permute.xlu0 %2180  ;;  %v2195_v48 = vsel %vm3103_vm1, %v2185_v20, %v2191_v15 }
0x1d1a   :  { %2183 = vst.msk [vmem:[%s3503_s7 + $0x8] sm:$0x30] %vm557_vm10, %v2181_v2 }
0x1d1b   :  { %2184 = vst.msk [vmem:[%s3503_s7 - $0x2] sm:$0x30] %vm559_vm11, %v2181_v2 }
0x1de1   :  { %v2268_v17 = vpop.f32.mrb[18].mxu1 }
0x1de2   :  { %v2275_v54 = vrot.slane %v2268_v17, 2  ;;  %v2270_v25 = vpop.f32.mrb[19].mxu1 }
0x1de3   :  { %v2276_v47 = vrot.slane %v2270_v25, 2 }
0x1de4   :  { %v2279_v27 = vadd.f32 %v2275_v54, %v2195_v48 }
0x1de5   :  { %v2280_v43 = vadd.f32 %v2276_v47, %v2196_v40 }
0x1de6   :  { %v2366_v32 = vmul.f32 -1.442695, %v2279_v27 }
0x1de7   :  { %v2367_v6 = vmul.f32 -1.442695, %v2280_v43 }
0x1de8   :  { %2834 = vpow2.f32 %v2366_v32 }
0x1de9   :  { %2836 = vtanh.f32 %v2280_v43 }
0x1df2   :  { %v2835_v58 = vpop.eup %2834 }
0x1df3   :  { %v2287_v59 = vadd.f32 1.0, %v2835_v58  ;;  %v2837_v61 = vpop.eup %2836 }
0x1df5   :  { %2838 = vrcp.f32 %v2287_v59 }
0x1df6   :  { %2840 = vpow2.f32 %v2367_v6 }
0x1dff   :  { %v2839_v1 = vpop.eup %2838 }
0x1e00   :  { %v2298_v60 = vmul.f32 %v2839_v1, %v2837_v61  ;;  %v2297_v16 = vmul.f32 %v2839_v1, %v2295_v63  ;;  %v2841_v29 = vpop.eup %2840 }
0x1e01   :  { %v2288_v4 = vadd.f32 1.0, %v2841_v29 }
0x1e02   :  { %2300 = vrot.lane.b32.xlu1 %v2298_v60, %s2899_s3 }
0x1e03   :  { %2842 = vrcp.f32 %v2288_v4 }
0x1e06   :  { %1681 = vrot.lane.b32.xlu1 %v3356_v24, %s2899_s3 }
0x1e0a   :  { %2053 = vrot.lane.b32.xlu1 %v3411_v19, %s2899_s3 }
0x1e0d   :  { %v2843_v19 = vpop.eup %2842 }
0x1e74   :  { %v2301_v5 = vpop.permute.xlu1 %2300 }
0x1e75   :  { %v2303_v23 = vadd.f32 %v2301_v5, %v2297_v16 }
0x1e77   :  { %2844 = vtanh.f32 %v2303_v23 }
0x1e78   :  { %v1682_v7 = vpop.permute.xlu1 %1681 }
0x1e79   :  { %1684 = vst.msk [vmem:[%s3503_s7] sm:$0x30] %vm557_vm10, %v1682_v7 }
0x1e7a   :  { %1685 = vst.msk [vmem:[%s3503_s7 + $0x6] sm:$0x30] %vm559_vm11, %v1682_v7 }
0x1e7c   :  { %v2054_v24 = vpop.permute.xlu1 %2053 }
0x1e7d   :  { %2056 = vst.msk [vmem:[%s3503_s7 + $0x8] sm:$0xc] %vm428_vm6, %v2054_v24 }
0x1e7e   :  { %2057 = vst.msk [vmem:[%s3503_s7 + $0x2] sm:$0xc] %vm430_vm7, %v2054_v24 }
0x1e81   :  { %v2845_v26 = vpop.eup %2844 }
0x1e82   :  { %v2305_v28 = vmul.f32 %v2845_v26, %v2843_v19 }
0x1e84   :  { %2307 = vrot.lane.b32.xlu1 %v2305_v28, %s2899_s3 }
0x1ef6   :  { %v2308_v3 = vpop.permute.xlu1 %2307 }
0x1ef7   :  { %2310 = vst.msk [vmem:[%s3503_s7 + $0x8] sm:$0xc0] %vm686_vm8, %v2308_v3 }
0x1ef8   :  { %2311 = vst.msk [vmem:[%s3503_s7 - $0x6] sm:$0xc0] %vm688_vm9, %v2308_v3 }
0x1ef9   :  { %2316 = vsyncpa [#allocation5], 1 }
0x1efa   :  { %2317 = vsyncpa [#allocation7], 1 }

</bundles_post_ra>
